<compile_context>
chip_gen: v7x
topology: tpu7x:2x2x1
jax: 0.10.0
libtpu: 0.0.40
codegen_flags: <defaults>
</compile_context>

<pallas_src>
import functools

import jax
import jax.numpy as jnp
from jax.experimental import pallas as pl
from jax.experimental.pallas import tpu as pltpu

_EPS = 1e-7
_GAMMA = 2.0
_ALPHA = 0.25
_CLASS_W = (0.6, 0.2, 0.2)  # softmax_focal_loss class weights (=> Cd == 3)


def _square(x):
    return x * x


def _round_up(x, m):
    return ((x + m - 1) // m) * m


def _make_kernel(*, n, cd, cs, hw, tile, poi_count):
    """Builds the grid kernel for fixed (static) shapes."""
    need_mask = (hw % tile) != 0

    def kernel(det_ref, detgt_ref, seg_ref, seggt_ref, poi_ref, poigt_ref,
               out_ref, *acc):
        # ---- unpack (1,1) VMEM scalar accumulators ----
        det_ce_acc = acc[0]
        det_inter = acc[1:1 + cd]
        det_sumy = acc[1 + cd:1 + 2 * cd]
        det_sump = acc[1 + 2 * cd:1 + 3 * cd]
        b = 1 + 3 * cd
        seg_ce_acc = acc[b]
        seg_inter = acc[b + 1:b + 1 + cs]
        seg_sumy = acc[b + 1 + cs:b + 1 + 2 * cs]
        seg_sump = acc[b + 1 + 2 * cs:b + 1 + 3 * cs]
        poi_acc = acc[b + 1 + 3 * cs]

        t = pl.program_id(0)

        @pl.when(t == 0)
        def _init():
            zero = jnp.zeros((1, 1), jnp.float32)
            for a in acc:
                a[...] = zero

        # lane mask for the (possibly) padded tail tile; only built if needed
        if need_mask:
            col = t * tile + jax.lax.broadcasted_iota(jnp.int32, (1, tile), 1)
            lane_mask = (col < hw).astype(jnp.float32)

            def msum(v):
                return jnp.sum(v * lane_mask)
        else:
            def msum(v):
                return jnp.sum(v)

        # ----------------- detection branch -----------------
        # pass 1: channel max and sum-exp (single softmax; the second
        # log_softmax of the reference is a mathematical no-op and is removed)
        m = det_ref[0:n, :].astype(jnp.float32)
        for c in range(1, cd):
            m = jnp.maximum(m, det_ref[c * n:(c + 1) * n, :].astype(jnp.float32))
        e = []
        s = None
        for c in range(cd):
            ec = jnp.exp(det_ref[c * n:(c + 1) * n, :].astype(jnp.float32) - m)
            e.append(ec)
            s = ec if s is None else s + ec
        log_s = jnp.log(s)
        inv_s = pl.reciprocal(s, approx=True)

        # pass 2: fold CE and dice statistics into accumulators channel by
        # channel (few live temporaries per channel).
        ce = None
        for c in range(cd):
            xc = det_ref[c * n:(c + 1) * n, :].astype(jnp.float32)
            yc = detgt_ref[c * n:(c + 1) * n, :].astype(jnp.float32)
            lp_c = (xc - m) - log_s                 # log_softmax(logit_det)
            term = (_CLASS_W[c] * yc) * lp_c
            ce = term if ce is None else ce + term
            prob_c = e[c] * inv_s                    # softmax(logit_det)
            det_inter[c][...] += jnp.sum(yc * prob_c)
            det_sumy[c][...] += jnp.sum(yc)          # zero in padding
            det_sump[c][...] += msum(prob_c)         # mask padding (prob!=0)
        ce = -ce                                     # weighted soft-target CE
        one_m = 1.0 - jnp.exp(-ce)                   # focal term (gamma = 2)
        det_ce_acc[...] += jnp.sum(one_m * one_m * ce)   # zero in padding

        # ----------------- segmentation branch -----------------
        z = seg_ref[...].astype(jnp.float32)
        yt = seggt_ref[...].astype(jnp.float32)
        ez = jnp.exp(-z)
        s1p = 1.0 + ez
        nlogp = -jnp.log(s1p)                        # log(sigmoid(z))
        log_p = jnp.maximum(nlogp, -100.0)           # PyTorch BCE clamp
        # log(1 - sigmoid(z)) = log(sigmoid(z)) - z  (saves one log; clamped)
        log_1mp = jnp.maximum(jnp.minimum(nlogp - z, 0.0), -100.0)
        logpt = -(yt * log_p + (1.0 - yt) * log_1mp)
        f1 = 1.0 - jnp.exp(-logpt)
        wgt = _ALPHA * yt + (1.0 - _ALPHA) * (1.0 - yt)
        seg_ce_acc[...] += msum(f1 * f1 * logpt * wgt)

        ps = pl.reciprocal(s1p, approx=True)         # sigmoid(z), dice only
        for c in range(cs):
            yc = yt[c * n:(c + 1) * n, :]
            pc = ps[c * n:(c + 1) * n, :]
            seg_inter[c][...] += jnp.sum(yc * pc)
            seg_sumy[c][...] += jnp.sum(yc)
            seg_sump[c][...] += msum(pc)

        # ----------------- POI branch (MSE) -----------------
        d = poi_ref[...].astype(jnp.float32) - poigt_ref[...].astype(jnp.float32)
        poi_acc[...] += jnp.sum(d * d)               # zero in padding

        # ----------------- finalize -----------------
        @pl.when(t == pl.num_programs(0) - 1)
        def _finalize():
            det_ce = det_ce_acc[...] * (1.0 / float(n * hw))
            det_dice = jnp.zeros((1, 1), jnp.float32)
            for c in range(cd):
                sum_y = det_sumy[c][...]
                card = sum_y + det_sump[c][...]
                dice = 1.0 - 2.0 * det_inter[c][...] / jnp.maximum(card, _EPS)
                det_dice = det_dice + dice * (sum_y > 0.0).astype(jnp.float32)
            det_dice = det_dice * (1.0 / float(cd))

            seg_ce = seg_ce_acc[...] * (1.0 / float(n * cs * hw))
            seg_dice = jnp.zeros((1, 1), jnp.float32)
            for c in range(cs):
                sum_y = seg_sumy[c][...]
                card = sum_y + seg_sump[c][...]
                dice = 1.0 - 2.0 * seg_inter[c][...] / jnp.maximum(card, _EPS)
                seg_dice = seg_dice + dice * (sum_y > 0.0).astype(jnp.float32)
            seg_dice = seg_dice * (1.0 / float(cs))

            poi = poi_acc[...] * (1.0 / float(poi_count))
            out_ref[...] = det_ce + det_dice + seg_ce + seg_dice + poi

    return kernel


@functools.partial(jax.jit, static_argnames=("tile_hw",))
def cell_det_seg_poi_loss(logit_det, logit_seg, logit_poi,
                          cell_gt, tissue_segmap, poi_gt, tile_hw=8192):
    """Pallas implementation of Cell_DET_SEG_POI_Loss.forward (NCHW inputs)."""
    assert logit_det.shape == cell_gt.shape
    assert logit_seg.shape == tissue_segmap.shape
    assert logit_poi.shape == poi_gt.shape

    n, cd, h, w = logit_det.shape
    _, cs, hs, ws = logit_seg.shape
    np_, cp, hp, wp = logit_poi.shape
    hw = h * w
    assert cd == len(_CLASS_W)                 # class weights imply 3 det classes
    assert np_ == n and hs * ws == hw and hp * wp == hw  # shared spatial extent

    # Tile the flattened spatial (lane) axis; TILE is a multiple of 128.
    tile = min(_round_up(int(tile_hw), 128), _round_up(hw, 128))
    hw_pad = _round_up(hw, tile)
    nt = hw_pad // tile

    # Channel-major 2-D layout: (C*N, HW) -- channel c occupies rows
    # [c*N, (c+1)*N).  Zero-pad the lane axis to a multiple of the tile.
    def prep(x, c, channel_major):
        x = x.reshape(n, c, hw)
        if channel_major:
            x = jnp.transpose(x, (1, 0, 2))
        x = x.reshape(c * n, hw)
        if hw_pad != hw:
            x = jnp.pad(x, ((0, 0), (0, hw_pad - hw)))
        return x

    ld = prep(logit_det, cd, True)
    cg = prep(cell_gt, cd, True)
    ls = prep(logit_seg, cs, True)
    ts = prep(tissue_segmap, cs, True)
    lp = prep(logit_poi, cp, False)
    pg = prep(poi_gt, cp, False)

    num_acc = 3 + 3 * (cd + cs)
    kernel = _make_kernel(n=n, cd=cd, cs=cs, hw=hw, tile=tile,
                          poi_count=n * cp * hw)

    # VMEM budget: double-buffered input tiles + f32 working copies + slack,
    # kept well below the v7x 64 MiB physical ceiling.
    tile_bytes = 4 * tile * (2 * cd * n + 2 * cs * n + 2 * cp * n)
    vmem_limit = int(min(max(6 * tile_bytes, 32 << 20), 48 << 20))

    _im = lambda t: (0, t)
    grid_spec = pltpu.PrefetchScalarGridSpec(
        num_scalar_prefetch=0,
        grid=(nt,),
        in_specs=[
            pl.BlockSpec((cd * n, tile), _im),
            pl.BlockSpec((cd * n, tile), _im),
            pl.BlockSpec((cs * n, tile), _im),
            pl.BlockSpec((cs * n, tile), _im),
            pl.BlockSpec((cp * n, tile), _im),
            pl.BlockSpec((cp * n, tile), _im),
        ],
        out_specs=pl.BlockSpec((1, 1), lambda t: (0, 0)),
        scratch_shapes=[pltpu.VMEM((1, 1), jnp.float32)] * num_acc,
    )

    out = pl.pallas_call(
        kernel,
        out_shape=jax.ShapeDtypeStruct((1, 1), jnp.float32),
        grid_spec=grid_spec,
        compiler_params=pltpu.CompilerParams(
            dimension_semantics=("arbitrary",),
            vmem_limit_bytes=vmem_limit),
    )(ld, cg, ls, ts, lp, pg)
    return out[0, 0]
    # TODO(synk): on v7x, split the spatial tiles across the 2 TensorCores
    # (leading "parallel" grid axis + per-core partial sums combined host-side).


def _reference_loss(logit_det, logit_seg, logit_poi, cell_gt, tissue_segmap, poi_gt):
    """Pure-JAX reference mirroring the PyTorch module exactly."""
    w = jnp.array(_CLASS_W, jnp.float32).reshape(1, 3, 1, 1)
    lp1 = jax.nn.log_softmax(logit_det, axis=1)
    lp2 = jax.nn.log_softmax(lp1, axis=1)      # F.cross_entropy re-normalizes
    ce = -jnp.sum(w * cell_gt * lp2, axis=1)
    det_ce = jnp.mean(_square(1.0 - jnp.exp(-ce)) * ce)

    def dice(y_true, y_pred):
        mask = (jnp.sum(y_true, axis=(0, 2, 3)) > 0).astype(jnp.float32)
        inter = jnp.sum(y_true * y_pred, axis=(0, 2, 3))
        card = jnp.sum(y_true + y_pred, axis=(0, 2, 3))
        return jnp.mean((1.0 - 2.0 * inter / jnp.maximum(card, _EPS)) * mask)

    det_dice = dice(cell_gt, jax.nn.softmax(logit_det, axis=1))

    p = jax.nn.sigmoid(logit_seg)
    logpt = -(tissue_segmap * jnp.maximum(jnp.log(p), -100.0)
              + (1.0 - tissue_segmap) * jnp.maximum(jnp.log(1.0 - p), -100.0))
    seg_ce = jnp.mean(_square(1.0 - jnp.exp(-logpt)) * logpt
                      * (_ALPHA * tissue_segmap + (1.0 - _ALPHA) * (1.0 - tissue_segmap)))
    seg_dice = dice(tissue_segmap, p)
    poi_l2 = jnp.mean(_square(logit_poi - poi_gt))
    return det_ce + det_dice + seg_ce + seg_dice + poi_l2


if __name__ == "__main__":
    key = jax.random.PRNGKey(0)
    k1, k2, k3, k4, k5, k6 = jax.random.split(key, 6)

    # Small shapes; H*W = 208 is deliberately not a multiple of the 128-wide
    # tile so the multi-step grid, accumulators and the tail-mask path are all
    # exercised.
    N, Cd, H, W = 2, 3, 16, 13     # detection: 3 classes (matches [0.6,0.2,0.2])
    Cs = 1                         # segmentation: single tissue channel
    Cp = 2                         # POI: 2-channel offset map

    logit_det = jax.random.normal(k1, (N, Cd, H, W), jnp.float32)
    cell_gt = jax.nn.softmax(jax.random.normal(k2, (N, Cd, H, W), jnp.float32) * 3.0, axis=1)
    logit_seg = jax.random.normal(k3, (N, Cs, H, W), jnp.float32)
    tissue_segmap = jax.random.bernoulli(k4, 0.4, (N, Cs, H, W)).astype(jnp.float32)
    logit_poi = jax.random.normal(k5, (N, Cp, H, W), jnp.float32)
    poi_gt = jax.random.normal(k6, (N, Cp, H, W), jnp.float32)

    loss = cell_det_seg_poi_loss(logit_det, logit_seg, logit_poi,
                                 cell_gt, tissue_segmap, poi_gt, tile_hw=128)
    loss = jax.block_until_ready(loss)

    ref = _reference_loss(logit_det, logit_seg, logit_poi,
                          cell_gt, tissue_segmap, poi_gt)
    assert jnp.allclose(loss, ref, rtol=1e-3, atol=1e-4), (loss, ref)

    print("KERNEL_OK")
</pallas_src>

<mosaic_0001>
module attributes {stable_mosaic.version = 11 : i64} {
  func.func @kernel(%arg0: i32, %arg1: memref<6x128xf32, #tpu.memory_space<vmem>>, %arg2: memref<6x128xf32, #tpu.memory_space<vmem>>, %arg3: memref<2x128xf32, #tpu.memory_space<vmem>>, %arg4: memref<2x128xf32, #tpu.memory_space<vmem>>, %arg5: memref<4x128xf32, #tpu.memory_space<vmem>>, %arg6: memref<4x128xf32, #tpu.memory_space<vmem>>, %arg7: memref<1x1xf32, #tpu.memory_space<vmem>>, %arg8: memref<1x1xf32, #tpu.memory_space<vmem>>, %arg9: memref<1x1xf32, #tpu.memory_space<vmem>>, %arg10: memref<1x1xf32, #tpu.memory_space<vmem>>, %arg11: memref<1x1xf32, #tpu.memory_space<vmem>>, %arg12: memref<1x1xf32, #tpu.memory_space<vmem>>, %arg13: memref<1x1xf32, #tpu.memory_space<vmem>>, %arg14: memref<1x1xf32, #tpu.memory_space<vmem>>, %arg15: memref<1x1xf32, #tpu.memory_space<vmem>>, %arg16: memref<1x1xf32, #tpu.memory_space<vmem>>, %arg17: memref<1x1xf32, #tpu.memory_space<vmem>>, %arg18: memref<1x1xf32, #tpu.memory_space<vmem>>, %arg19: memref<1x1xf32, #tpu.memory_space<vmem>>, %arg20: memref<1x1xf32, #tpu.memory_space<vmem>>, %arg21: memref<1x1xf32, #tpu.memory_space<vmem>>, %arg22: memref<1x1xf32, #tpu.memory_space<vmem>>) attributes {dimension_semantics = [#tpu.dimension_semantics<arbitrary>], iteration_bounds = array<i64: 2>, scalar_prefetch = 0 : i64, scratch_operands = 15 : i64, tpu.core_type = #tpu.core_type<tc>, window_params = [{transform_indices = @transform_0, window_bounds = array<i64: 6, 128>}, {transform_indices = @transform_1, window_bounds = array<i64: 6, 128>}, {transform_indices = @transform_2, window_bounds = array<i64: 2, 128>}, {transform_indices = @transform_3, window_bounds = array<i64: 2, 128>}, {transform_indices = @transform_4, window_bounds = array<i64: 4, 128>}, {transform_indices = @transform_5, window_bounds = array<i64: 4, 128>}, {pipeline_mode = #tpu.pipeline_mode<synchronous>, transform_indices = @transform_6, window_bounds = array<i64: 1, 1>}]} {
    %c0_i32 = arith.constant 0 : i32
    %0 = arith.cmpi eq, %arg0, %c0_i32 : i32
    %1 = arith.extui %0 : i1 to i32
    %c0_i32_0 = arith.constant 0 : i32
    %2 = arith.cmpi ne, %1, %c0_i32_0 : i32
    scf.if %2 {
      %cst_124 = arith.constant 0.000000e+00 : f32
      %245 = vector.broadcast %cst_124 : f32 to vector<1x1xf32>
      %c0_125 = arith.constant 0 : index
      %c0_126 = arith.constant 0 : index
      %246 = vector.load %arg8[%c0_125, %c0_126] : memref<1x1xf32, #tpu.memory_space<vmem>>, vector<1x1xf32>
      tpu.vector_store %arg8[%c0_125, %c0_126], %245 {strides = array<i32>} : memref<1x1xf32, #tpu.memory_space<vmem>>, vector<1x1xf32>,
      %c0_127 = arith.constant 0 : index
      %c0_128 = arith.constant 0 : index
      %247 = vector.load %arg9[%c0_127, %c0_128] : memref<1x1xf32, #tpu.memory_space<vmem>>, vector<1x1xf32>
      tpu.vector_store %arg9[%c0_127, %c0_128], %245 {strides = array<i32>} : memref<1x1xf32, #tpu.memory_space<vmem>>, vector<1x1xf32>,
      %c0_129 = arith.constant 0 : index
      %c0_130 = arith.constant 0 : index
      %248 = vector.load %arg10[%c0_129, %c0_130] : memref<1x1xf32, #tpu.memory_space<vmem>>, vector<1x1xf32>
      tpu.vector_store %arg10[%c0_129, %c0_130], %245 {strides = array<i32>} : memref<1x1xf32, #tpu.memory_space<vmem>>, vector<1x1xf32>,
      %c0_131 = arith.constant 0 : index
      %c0_132 = arith.constant 0 : index
      %249 = vector.load %arg11[%c0_131, %c0_132] : memref<1x1xf32, #tpu.memory_space<vmem>>, vector<1x1xf32>
      tpu.vector_store %arg11[%c0_131, %c0_132], %245 {strides = array<i32>} : memref<1x1xf32, #tpu.memory_space<vmem>>, vector<1x1xf32>,
      %c0_133 = arith.constant 0 : index
      %c0_134 = arith.constant 0 : index
      %250 = vector.load %arg12[%c0_133, %c0_134] : memref<1x1xf32, #tpu.memory_space<vmem>>, vector<1x1xf32>
      tpu.vector_store %arg12[%c0_133, %c0_134], %245 {strides = array<i32>} : memref<1x1xf32, #tpu.memory_space<vmem>>, vector<1x1xf32>,
      %c0_135 = arith.constant 0 : index
      %c0_136 = arith.constant 0 : index
      %251 = vector.load %arg13[%c0_135, %c0_136] : memref<1x1xf32, #tpu.memory_space<vmem>>, vector<1x1xf32>
      tpu.vector_store %arg13[%c0_135, %c0_136], %245 {strides = array<i32>} : memref<1x1xf32, #tpu.memory_space<vmem>>, vector<1x1xf32>,
      %c0_137 = arith.constant 0 : index
      %c0_138 = arith.constant 0 : index
      %252 = vector.load %arg14[%c0_137, %c0_138] : memref<1x1xf32, #tpu.memory_space<vmem>>, vector<1x1xf32>
      tpu.vector_store %arg14[%c0_137, %c0_138], %245 {strides = array<i32>} : memref<1x1xf32, #tpu.memory_space<vmem>>, vector<1x1xf32>,
      %c0_139 = arith.constant 0 : index
      %c0_140 = arith.constant 0 : index
      %253 = vector.load %arg15[%c0_139, %c0_140] : memref<1x1xf32, #tpu.memory_space<vmem>>, vector<1x1xf32>
      tpu.vector_store %arg15[%c0_139, %c0_140], %245 {strides = array<i32>} : memref<1x1xf32, #tpu.memory_space<vmem>>, vector<1x1xf32>,
      %c0_141 = arith.constant 0 : index
      %c0_142 = arith.constant 0 : index
      %254 = vector.load %arg16[%c0_141, %c0_142] : memref<1x1xf32, #tpu.memory_space<vmem>>, vector<1x1xf32>
      tpu.vector_store %arg16[%c0_141, %c0_142], %245 {strides = array<i32>} : memref<1x1xf32, #tpu.memory_space<vmem>>, vector<1x1xf32>,
      %c0_143 = arith.constant 0 : index
      %c0_144 = arith.constant 0 : index
      %255 = vector.load %arg17[%c0_143, %c0_144] : memref<1x1xf32, #tpu.memory_space<vmem>>, vector<1x1xf32>
      tpu.vector_store %arg17[%c0_143, %c0_144], %245 {strides = array<i32>} : memref<1x1xf32, #tpu.memory_space<vmem>>, vector<1x1xf32>,
      %c0_145 = arith.constant 0 : index
      %c0_146 = arith.constant 0 : index
      %256 = vector.load %arg18[%c0_145, %c0_146] : memref<1x1xf32, #tpu.memory_space<vmem>>, vector<1x1xf32>
      tpu.vector_store %arg18[%c0_145, %c0_146], %245 {strides = array<i32>} : memref<1x1xf32, #tpu.memory_space<vmem>>, vector<1x1xf32>,
      %c0_147 = arith.constant 0 : index
      %c0_148 = arith.constant 0 : index
      %257 = vector.load %arg19[%c0_147, %c0_148] : memref<1x1xf32, #tpu.memory_space<vmem>>, vector<1x1xf32>
      tpu.vector_store %arg19[%c0_147, %c0_148], %245 {strides = array<i32>} : memref<1x1xf32, #tpu.memory_space<vmem>>, vector<1x1xf32>,
      %c0_149 = arith.constant 0 : index
      %c0_150 = arith.constant 0 : index
      %258 = vector.load %arg20[%c0_149, %c0_150] : memref<1x1xf32, #tpu.memory_space<vmem>>, vector<1x1xf32>
      tpu.vector_store %arg20[%c0_149, %c0_150], %245 {strides = array<i32>} : memref<1x1xf32, #tpu.memory_space<vmem>>, vector<1x1xf32>,
      %c0_151 = arith.constant 0 : index
      %c0_152 = arith.constant 0 : index
      %259 = vector.load %arg21[%c0_151, %c0_152] : memref<1x1xf32, #tpu.memory_space<vmem>>, vector<1x1xf32>
      tpu.vector_store %arg21[%c0_151, %c0_152], %245 {strides = array<i32>} : memref<1x1xf32, #tpu.memory_space<vmem>>, vector<1x1xf32>,
      %c0_153 = arith.constant 0 : index
      %c0_154 = arith.constant 0 : index
      %260 = vector.load %arg22[%c0_153, %c0_154] : memref<1x1xf32, #tpu.memory_space<vmem>>, vector<1x1xf32>
      tpu.vector_store %arg22[%c0_153, %c0_154], %245 {strides = array<i32>} : memref<1x1xf32, #tpu.memory_space<vmem>>, vector<1x1xf32>,
    } else {
    }
    %c128_i32 = arith.constant 128 : i32
    %3 = arith.muli %arg0, %c128_i32 : i32
    %4 = tpu.iota {dimensions = array<i32: 1>} : vector<1x128xi32>
    %5 = vector.broadcast %3 : i32 to vector<1x128xi32>
    %6 = arith.addi %5, %4 : vector<1x128xi32>
    %c208_i32 = arith.constant 208 : i32
    %7 = vector.broadcast %c208_i32 : i32 to vector<1x128xi32>
    %8 = arith.cmpi slt, %6, %7 : vector<1x128xi32>
    %9 = arith.extui %8 : vector<1x128xi1> to vector<1x128xi32>
    %10 = arith.sitofp %9 : vector<1x128xi32> to vector<1x128xf32>
    %c0 = arith.constant 0 : index
    %c0_1 = arith.constant 0 : index
    %11 = vector.load %arg1[%c0, %c0_1] : memref<6x128xf32, #tpu.memory_space<vmem>>, vector<2x128xf32>
    %c2 = arith.constant 2 : index
    %c0_2 = arith.constant 0 : index
    %12 = vector.load %arg1[%c2, %c0_2] : memref<6x128xf32, #tpu.memory_space<vmem>>, vector<2x128xf32>
    %13 = arith.maximumf %11, %12 : vector<2x128xf32>
    %c4 = arith.constant 4 : index
    %c0_3 = arith.constant 0 : index
    %14 = vector.load %arg1[%c4, %c0_3] : memref<6x128xf32, #tpu.memory_space<vmem>>, vector<2x128xf32>
    %15 = arith.maximumf %13, %14 : vector<2x128xf32>
    %c0_4 = arith.constant 0 : index
    %c0_5 = arith.constant 0 : index
    %16 = vector.load %arg1[%c0_4, %c0_5] : memref<6x128xf32, #tpu.memory_space<vmem>>, vector<2x128xf32>
    %17 = arith.subf %16, %15 : vector<2x128xf32>
    %18 = math.exp %17 : vector<2x128xf32>
    %c2_6 = arith.constant 2 : index
    %c0_7 = arith.constant 0 : index
    %19 = vector.load %arg1[%c2_6, %c0_7] : memref<6x128xf32, #tpu.memory_space<vmem>>, vector<2x128xf32>
    %20 = arith.subf %19, %15 : vector<2x128xf32>
    %21 = math.exp %20 : vector<2x128xf32>
    %22 = arith.addf %18, %21 : vector<2x128xf32>
    %c4_8 = arith.constant 4 : index
    %c0_9 = arith.constant 0 : index
    %23 = vector.load %arg1[%c4_8, %c0_9] : memref<6x128xf32, #tpu.memory_space<vmem>>, vector<2x128xf32>
    %24 = arith.subf %23, %15 : vector<2x128xf32>
    %25 = math.exp %24 : vector<2x128xf32>
    %26 = arith.addf %22, %25 : vector<2x128xf32>
    %27 = math.log %26 : vector<2x128xf32>
    %28 = tpu.reciprocal %26 {approx = true} : vector<2x128xf32> -> vector<2x128xf32>
    %c0_10 = arith.constant 0 : index
    %c0_11 = arith.constant 0 : index
    %29 = vector.load %arg1[%c0_10, %c0_11] : memref<6x128xf32, #tpu.memory_space<vmem>>, vector<2x128xf32>
    %c0_12 = arith.constant 0 : index
    %c0_13 = arith.constant 0 : index
    %30 = vector.load %arg2[%c0_12, %c0_13] : memref<6x128xf32, #tpu.memory_space<vmem>>, vector<2x128xf32>
    %31 = arith.subf %29, %15 : vector<2x128xf32>
    %32 = arith.subf %31, %27 : vector<2x128xf32>
    %cst = arith.constant 6.000000e-01 : f32
    %33 = vector.broadcast %cst : f32 to vector<2x128xf32>
    %34 = arith.mulf %33, %30 : vector<2x128xf32>
    %35 = arith.mulf %34, %32 : vector<2x128xf32>
    %36 = arith.mulf %18, %28 : vector<2x128xf32>
    %c0_14 = arith.constant 0 : index
    %c0_15 = arith.constant 0 : index
    %37 = vector.load %arg9[%c0_14, %c0_15] : memref<1x1xf32, #tpu.memory_space<vmem>>, vector<1x1xf32>
    %38 = arith.mulf %30, %36 : vector<2x128xf32>
    %39 = vector.shape_cast %38 : vector<2x128xf32> to vector<1x2x128xf32>
    %cst_16 = arith.constant dense<0.000000e+00> : vector<1xf32>
    %40 = vector.multi_reduction <add>, %39, %cst_16 [1, 2] : vector<1x2x128xf32> to vector<1xf32>
    %41 = vector.shape_cast %40 : vector<1xf32> to vector<1x1x1xf32>
    %42 = vector.extract %41[0, 0, 0] : f32 from vector<1x1x1xf32>
    %43 = vector.broadcast %42 : f32 to vector<1x1xf32>
    %44 = arith.addf %37, %43 : vector<1x1xf32>
    %c0_17 = arith.constant 0 : index
    %c0_18 = arith.constant 0 : index
    %45 = vector.load %arg9[%c0_17, %c0_18] : memref<1x1xf32, #tpu.memory_space<vmem>>, vector<1x1xf32>
    tpu.vector_store %arg9[%c0_17, %c0_18], %44 {strides = array<i32>} : memref<1x1xf32, #tpu.memory_space<vmem>>, vector<1x1xf32>,
    %c0_19 = arith.constant 0 : index
    %c0_20 = arith.constant 0 : index
    %46 = vector.load %arg12[%c0_19, %c0_20] : memref<1x1xf32, #tpu.memory_space<vmem>>, vector<1x1xf32>
    %47 = vector.shape_cast %30 : vector<2x128xf32> to vector<1x2x128xf32>
    %cst_21 = arith.constant dense<0.000000e+00> : vector<1xf32>
    %48 = vector.multi_reduction <add>, %47, %cst_21 [1, 2] : vector<1x2x128xf32> to vector<1xf32>
    %49 = vector.shape_cast %48 : vector<1xf32> to vector<1x1x1xf32>
    %50 = vector.extract %49[0, 0, 0] : f32 from vector<1x1x1xf32>
    %51 = vector.broadcast %50 : f32 to vector<1x1xf32>
    %52 = arith.addf %46, %51 : vector<1x1xf32>
    %c0_22 = arith.constant 0 : index
    %c0_23 = arith.constant 0 : index
    %53 = vector.load %arg12[%c0_22, %c0_23] : memref<1x1xf32, #tpu.memory_space<vmem>>, vector<1x1xf32>
    tpu.vector_store %arg12[%c0_22, %c0_23], %52 {strides = array<i32>} : memref<1x1xf32, #tpu.memory_space<vmem>>, vector<1x1xf32>,
    %c0_24 = arith.constant 0 : index
    %c0_25 = arith.constant 0 : index
    %54 = vector.load %arg15[%c0_24, %c0_25] : memref<1x1xf32, #tpu.memory_space<vmem>>, vector<1x1xf32>
    %55 = vector.broadcast %10 : vector<1x128xf32> to vector<2x128xf32>
    %56 = arith.mulf %36, %55 : vector<2x128xf32>
    %57 = vector.shape_cast %56 : vector<2x128xf32> to vector<1x2x128xf32>
    %cst_26 = arith.constant dense<0.000000e+00> : vector<1xf32>
    %58 = vector.multi_reduction <add>, %57, %cst_26 [1, 2] : vector<1x2x128xf32> to vector<1xf32>
    %59 = vector.shape_cast %58 : vector<1xf32> to vector<1x1x1xf32>
    %60 = vector.extract %59[0, 0, 0] : f32 from vector<1x1x1xf32>
    %61 = vector.broadcast %60 : f32 to vector<1x1xf32>
    %62 = arith.addf %54, %61 : vector<1x1xf32>
    %c0_27 = arith.constant 0 : index
    %c0_28 = arith.constant 0 : index
    %63 = vector.load %arg15[%c0_27, %c0_28] : memref<1x1xf32, #tpu.memory_space<vmem>>, vector<1x1xf32>
    tpu.vector_store %arg15[%c0_27, %c0_28], %62 {strides = array<i32>} : memref<1x1xf32, #tpu.memory_space<vmem>>, vector<1x1xf32>,
    %c2_29 = arith.constant 2 : index
    %c0_30 = arith.constant 0 : index
    %64 = vector.load %arg1[%c2_29, %c0_30] : memref<6x128xf32, #tpu.memory_space<vmem>>, vector<2x128xf32>
    %c2_31 = arith.constant 2 : index
    %c0_32 = arith.constant 0 : index
    %65 = vector.load %arg2[%c2_31, %c0_32] : memref<6x128xf32, #tpu.memory_space<vmem>>, vector<2x128xf32>
    %66 = arith.subf %64, %15 : vector<2x128xf32>
    %67 = arith.subf %66, %27 : vector<2x128xf32>
    %cst_33 = arith.constant 2.000000e-01 : f32
    %68 = vector.broadcast %cst_33 : f32 to vector<2x128xf32>
    %69 = arith.mulf %68, %65 : vector<2x128xf32>
    %70 = arith.mulf %69, %67 : vector<2x128xf32>
    %71 = arith.addf %35, %70 : vector<2x128xf32>
    %72 = arith.mulf %21, %28 : vector<2x128xf32>
    %c0_34 = arith.constant 0 : index
    %c0_35 = arith.constant 0 : index
    %73 = vector.load %arg10[%c0_34, %c0_35] : memref<1x1xf32, #tpu.memory_space<vmem>>, vector<1x1xf32>
    %74 = arith.mulf %65, %72 : vector<2x128xf32>
    %75 = vector.shape_cast %74 : vector<2x128xf32> to vector<1x2x128xf32>
    %cst_36 = arith.constant dense<0.000000e+00> : vector<1xf32>
    %76 = vector.multi_reduction <add>, %75, %cst_36 [1, 2] : vector<1x2x128xf32> to vector<1xf32>
    %77 = vector.shape_cast %76 : vector<1xf32> to vector<1x1x1xf32>
    %78 = vector.extract %77[0, 0, 0] : f32 from vector<1x1x1xf32>
    %79 = vector.broadcast %78 : f32 to vector<1x1xf32>
    %80 = arith.addf %73, %79 : vector<1x1xf32>
    %c0_37 = arith.constant 0 : index
    %c0_38 = arith.constant 0 : index
    %81 = vector.load %arg10[%c0_37, %c0_38] : memref<1x1xf32, #tpu.memory_space<vmem>>, vector<1x1xf32>
    tpu.vector_store %arg10[%c0_37, %c0_38], %80 {strides = array<i32>} : memref<1x1xf32, #tpu.memory_space<vmem>>, vector<1x1xf32>,
    %c0_39 = arith.constant 0 : index
    %c0_40 = arith.constant 0 : index
    %82 = vector.load %arg13[%c0_39, %c0_40] : memref<1x1xf32, #tpu.memory_space<vmem>>, vector<1x1xf32>
    %83 = vector.shape_cast %65 : vector<2x128xf32> to vector<1x2x128xf32>
    %cst_41 = arith.constant dense<0.000000e+00> : vector<1xf32>
    %84 = vector.multi_reduction <add>, %83, %cst_41 [1, 2] : vector<1x2x128xf32> to vector<1xf32>
    %85 = vector.shape_cast %84 : vector<1xf32> to vector<1x1x1xf32>
    %86 = vector.extract %85[0, 0, 0] : f32 from vector<1x1x1xf32>
    %87 = vector.broadcast %86 : f32 to vector<1x1xf32>
    %88 = arith.addf %82, %87 : vector<1x1xf32>
    %c0_42 = arith.constant 0 : index
    %c0_43 = arith.constant 0 : index
    %89 = vector.load %arg13[%c0_42, %c0_43] : memref<1x1xf32, #tpu.memory_space<vmem>>, vector<1x1xf32>
    tpu.vector_store %arg13[%c0_42, %c0_43], %88 {strides = array<i32>} : memref<1x1xf32, #tpu.memory_space<vmem>>, vector<1x1xf32>,
    %c0_44 = arith.constant 0 : index
    %c0_45 = arith.constant 0 : index
    %90 = vector.load %arg16[%c0_44, %c0_45] : memref<1x1xf32, #tpu.memory_space<vmem>>, vector<1x1xf32>
    %91 = vector.broadcast %10 : vector<1x128xf32> to vector<2x128xf32>
    %92 = arith.mulf %72, %91 : vector<2x128xf32>
    %93 = vector.shape_cast %92 : vector<2x128xf32> to vector<1x2x128xf32>
    %cst_46 = arith.constant dense<0.000000e+00> : vector<1xf32>
    %94 = vector.multi_reduction <add>, %93, %cst_46 [1, 2] : vector<1x2x128xf32> to vector<1xf32>
    %95 = vector.shape_cast %94 : vector<1xf32> to vector<1x1x1xf32>
    %96 = vector.extract %95[0, 0, 0] : f32 from vector<1x1x1xf32>
    %97 = vector.broadcast %96 : f32 to vector<1x1xf32>
    %98 = arith.addf %90, %97 : vector<1x1xf32>
    %c0_47 = arith.constant 0 : index
    %c0_48 = arith.constant 0 : index
    %99 = vector.load %arg16[%c0_47, %c0_48] : memref<1x1xf32, #tpu.memory_space<vmem>>, vector<1x1xf32>
    tpu.vector_store %arg16[%c0_47, %c0_48], %98 {strides = array<i32>} : memref<1x1xf32, #tpu.memory_space<vmem>>, vector<1x1xf32>,
    %c4_49 = arith.constant 4 : index
    %c0_50 = arith.constant 0 : index
    %100 = vector.load %arg1[%c4_49, %c0_50] : memref<6x128xf32, #tpu.memory_space<vmem>>, vector<2x128xf32>
    %c4_51 = arith.constant 4 : index
    %c0_52 = arith.constant 0 : index
    %101 = vector.load %arg2[%c4_51, %c0_52] : memref<6x128xf32, #tpu.memory_space<vmem>>, vector<2x128xf32>
    %102 = arith.subf %100, %15 : vector<2x128xf32>
    %103 = arith.subf %102, %27 : vector<2x128xf32>
    %cst_53 = arith.constant 2.000000e-01 : f32
    %104 = vector.broadcast %cst_53 : f32 to vector<2x128xf32>
    %105 = arith.mulf %104, %101 : vector<2x128xf32>
    %106 = arith.mulf %105, %103 : vector<2x128xf32>
    %107 = arith.addf %71, %106 : vector<2x128xf32>
    %108 = arith.mulf %25, %28 : vector<2x128xf32>
    %c0_54 = arith.constant 0 : index
    %c0_55 = arith.constant 0 : index
    %109 = vector.load %arg11[%c0_54, %c0_55] : memref<1x1xf32, #tpu.memory_space<vmem>>, vector<1x1xf32>
    %110 = arith.mulf %101, %108 : vector<2x128xf32>
    %111 = vector.shape_cast %110 : vector<2x128xf32> to vector<1x2x128xf32>
    %cst_56 = arith.constant dense<0.000000e+00> : vector<1xf32>
    %112 = vector.multi_reduction <add>, %111, %cst_56 [1, 2] : vector<1x2x128xf32> to vector<1xf32>
    %113 = vector.shape_cast %112 : vector<1xf32> to vector<1x1x1xf32>
    %114 = vector.extract %113[0, 0, 0] : f32 from vector<1x1x1xf32>
    %115 = vector.broadcast %114 : f32 to vector<1x1xf32>
    %116 = arith.addf %109, %115 : vector<1x1xf32>
    %c0_57 = arith.constant 0 : index
    %c0_58 = arith.constant 0 : index
    %117 = vector.load %arg11[%c0_57, %c0_58] : memref<1x1xf32, #tpu.memory_space<vmem>>, vector<1x1xf32>
    tpu.vector_store %arg11[%c0_57, %c0_58], %116 {strides = array<i32>} : memref<1x1xf32, #tpu.memory_space<vmem>>, vector<1x1xf32>,
    %c0_59 = arith.constant 0 : index
    %c0_60 = arith.constant 0 : index
    %118 = vector.load %arg14[%c0_59, %c0_60] : memref<1x1xf32, #tpu.memory_space<vmem>>, vector<1x1xf32>
    %119 = vector.shape_cast %101 : vector<2x128xf32> to vector<1x2x128xf32>
    %cst_61 = arith.constant dense<0.000000e+00> : vector<1xf32>
    %120 = vector.multi_reduction <add>, %119, %cst_61 [1, 2] : vector<1x2x128xf32> to vector<1xf32>
    %121 = vector.shape_cast %120 : vector<1xf32> to vector<1x1x1xf32>
    %122 = vector.extract %121[0, 0, 0] : f32 from vector<1x1x1xf32>
    %123 = vector.broadcast %122 : f32 to vector<1x1xf32>
    %124 = arith.addf %118, %123 : vector<1x1xf32>
    %c0_62 = arith.constant 0 : index
    %c0_63 = arith.constant 0 : index
    %125 = vector.load %arg14[%c0_62, %c0_63] : memref<1x1xf32, #tpu.memory_space<vmem>>, vector<1x1xf32>
    tpu.vector_store %arg14[%c0_62, %c0_63], %124 {strides = array<i32>} : memref<1x1xf32, #tpu.memory_space<vmem>>, vector<1x1xf32>,
    %c0_64 = arith.constant 0 : index
    %c0_65 = arith.constant 0 : index
    %126 = vector.load %arg17[%c0_64, %c0_65] : memref<1x1xf32, #tpu.memory_space<vmem>>, vector<1x1xf32>
    %127 = vector.broadcast %10 : vector<1x128xf32> to vector<2x128xf32>
    %128 = arith.mulf %108, %127 : vector<2x128xf32>
    %129 = vector.shape_cast %128 : vector<2x128xf32> to vector<1x2x128xf32>
    %cst_66 = arith.constant dense<0.000000e+00> : vector<1xf32>
    %130 = vector.multi_reduction <add>, %129, %cst_66 [1, 2] : vector<1x2x128xf32> to vector<1xf32>
    %131 = vector.shape_cast %130 : vector<1xf32> to vector<1x1x1xf32>
    %132 = vector.extract %131[0, 0, 0] : f32 from vector<1x1x1xf32>
    %133 = vector.broadcast %132 : f32 to vector<1x1xf32>
    %134 = arith.addf %126, %133 : vector<1x1xf32>
    %c0_67 = arith.constant 0 : index
    %c0_68 = arith.constant 0 : index
    %135 = vector.load %arg17[%c0_67, %c0_68] : memref<1x1xf32, #tpu.memory_space<vmem>>, vector<1x1xf32>
    tpu.vector_store %arg17[%c0_67, %c0_68], %134 {strides = array<i32>} : memref<1x1xf32, #tpu.memory_space<vmem>>, vector<1x1xf32>,
    %cst_69 = arith.constant 0.000000e+00 : f32
    %136 = vector.broadcast %cst_69 : f32 to vector<2x128xf32>
    %137 = arith.subf %136, %107 : vector<2x128xf32>
    %cst_70 = arith.constant 0.000000e+00 : f32
    %138 = vector.broadcast %cst_70 : f32 to vector<2x128xf32>
    %139 = arith.subf %138, %137 : vector<2x128xf32>
    %140 = math.exp %139 : vector<2x128xf32>
    %cst_71 = arith.constant 1.000000e+00 : f32
    %141 = vector.broadcast %cst_71 : f32 to vector<2x128xf32>
    %142 = arith.subf %141, %140 : vector<2x128xf32>
    %c0_72 = arith.constant 0 : index
    %c0_73 = arith.constant 0 : index
    %143 = vector.load %arg8[%c0_72, %c0_73] : memref<1x1xf32, #tpu.memory_space<vmem>>, vector<1x1xf32>
    %144 = arith.mulf %142, %142 : vector<2x128xf32>
    %145 = arith.mulf %144, %137 : vector<2x128xf32>
    %146 = vector.shape_cast %145 : vector<2x128xf32> to vector<1x2x128xf32>
    %cst_74 = arith.constant dense<0.000000e+00> : vector<1xf32>
    %147 = vector.multi_reduction <add>, %146, %cst_74 [1, 2] : vector<1x2x128xf32> to vector<1xf32>
    %148 = vector.shape_cast %147 : vector<1xf32> to vector<1x1x1xf32>
    %149 = vector.extract %148[0, 0, 0] : f32 from vector<1x1x1xf32>
    %150 = vector.broadcast %149 : f32 to vector<1x1xf32>
    %151 = arith.addf %143, %150 : vector<1x1xf32>
    %c0_75 = arith.constant 0 : index
    %c0_76 = arith.constant 0 : index
    %152 = vector.load %arg8[%c0_75, %c0_76] : memref<1x1xf32, #tpu.memory_space<vmem>>, vector<1x1xf32>
    tpu.vector_store %arg8[%c0_75, %c0_76], %151 {strides = array<i32>} : memref<1x1xf32, #tpu.memory_space<vmem>>, vector<1x1xf32>,
    %c0_77 = arith.constant 0 : index
    %c0_78 = arith.constant 0 : index
    %153 = vector.load %arg3[%c0_77, %c0_78] : memref<2x128xf32, #tpu.memory_space<vmem>>, vector<2x128xf32>
    %c0_79 = arith.constant 0 : index
    %c0_80 = arith.constant 0 : index
    %154 = vector.load %arg4[%c0_79, %c0_80] : memref<2x128xf32, #tpu.memory_space<vmem>>, vector<2x128xf32>
    %cst_81 = arith.constant 0.000000e+00 : f32
    %155 = vector.broadcast %cst_81 : f32 to vector<2x128xf32>
    %156 = arith.subf %155, %153 : vector<2x128xf32>
    %157 = math.exp %156 : vector<2x128xf32>
    %cst_82 = arith.constant 1.000000e+00 : f32
    %158 = vector.broadcast %cst_82 : f32 to vector<2x128xf32>
    %159 = arith.addf %158, %157 : vector<2x128xf32>
    %160 = math.log %159 : vector<2x128xf32>
    %cst_83 = arith.constant 0.000000e+00 : f32
    %161 = vector.broadcast %cst_83 : f32 to vector<2x128xf32>
    %162 = arith.subf %161, %160 : vector<2x128xf32>
    %cst_84 = arith.constant -1.000000e+02 : f32
    %163 = vector.broadcast %cst_84 : f32 to vector<2x128xf32>
    %164 = arith.maximumf %162, %163 : vector<2x128xf32>
    %165 = arith.subf %162, %153 : vector<2x128xf32>
    %cst_85 = arith.constant 0.000000e+00 : f32
    %166 = vector.broadcast %cst_85 : f32 to vector<2x128xf32>
    %167 = arith.minimumf %165, %166 : vector<2x128xf32>
    %cst_86 = arith.constant -1.000000e+02 : f32
    %168 = vector.broadcast %cst_86 : f32 to vector<2x128xf32>
    %169 = arith.maximumf %167, %168 : vector<2x128xf32>
    %170 = arith.mulf %154, %164 : vector<2x128xf32>
    %cst_87 = arith.constant 1.000000e+00 : f32
    %171 = vector.broadcast %cst_87 : f32 to vector<2x128xf32>
    %172 = arith.subf %171, %154 : vector<2x128xf32>
    %173 = arith.mulf %172, %169 : vector<2x128xf32>
    %174 = arith.addf %170, %173 : vector<2x128xf32>
    %cst_88 = arith.constant 0.000000e+00 : f32
    %175 = vector.broadcast %cst_88 : f32 to vector<2x128xf32>
    %176 = arith.subf %175, %174 : vector<2x128xf32>
    %cst_89 = arith.constant 0.000000e+00 : f32
    %177 = vector.broadcast %cst_89 : f32 to vector<2x128xf32>
    %178 = arith.subf %177, %176 : vector<2x128xf32>
    %179 = math.exp %178 : vector<2x128xf32>
    %cst_90 = arith.constant 1.000000e+00 : f32
    %180 = vector.broadcast %cst_90 : f32 to vector<2x128xf32>
    %181 = arith.subf %180, %179 : vector<2x128xf32>
    %cst_91 = arith.constant 2.500000e-01 : f32
    %182 = vector.broadcast %cst_91 : f32 to vector<2x128xf32>
    %183 = arith.mulf %182, %154 : vector<2x128xf32>
    %cst_92 = arith.constant 1.000000e+00 : f32
    %184 = vector.broadcast %cst_92 : f32 to vector<2x128xf32>
    %185 = arith.subf %184, %154 : vector<2x128xf32>
    %cst_93 = arith.constant 7.500000e-01 : f32
    %186 = vector.broadcast %cst_93 : f32 to vector<2x128xf32>
    %187 = arith.mulf %186, %185 : vector<2x128xf32>
    %188 = arith.addf %183, %187 : vector<2x128xf32>
    %c0_94 = arith.constant 0 : index
    %c0_95 = arith.constant 0 : index
    %189 = vector.load %arg18[%c0_94, %c0_95] : memref<1x1xf32, #tpu.memory_space<vmem>>, vector<1x1xf32>
    %190 = arith.mulf %181, %181 : vector<2x128xf32>
    %191 = arith.mulf %190, %176 : vector<2x128xf32>
    %192 = arith.mulf %191, %188 : vector<2x128xf32>
    %193 = vector.broadcast %10 : vector<1x128xf32> to vector<2x128xf32>
    %194 = arith.mulf %192, %193 : vector<2x128xf32>
    %195 = vector.shape_cast %194 : vector<2x128xf32> to vector<1x2x128xf32>
    %cst_96 = arith.constant dense<0.000000e+00> : vector<1xf32>
    %196 = vector.multi_reduction <add>, %195, %cst_96 [1, 2] : vector<1x2x128xf32> to vector<1xf32>
    %197 = vector.shape_cast %196 : vector<1xf32> to vector<1x1x1xf32>
    %198 = vector.extract %197[0, 0, 0] : f32 from vector<1x1x1xf32>
    %199 = vector.broadcast %198 : f32 to vector<1x1xf32>
    %200 = arith.addf %189, %199 : vector<1x1xf32>
    %c0_97 = arith.constant 0 : index
    %c0_98 = arith.constant 0 : index
    %201 = vector.load %arg18[%c0_97, %c0_98] : memref<1x1xf32, #tpu.memory_space<vmem>>, vector<1x1xf32>
    tpu.vector_store %arg18[%c0_97, %c0_98], %200 {strides = array<i32>} : memref<1x1xf32, #tpu.memory_space<vmem>>, vector<1x1xf32>,
    %202 = tpu.reciprocal %159 {approx = true} : vector<2x128xf32> -> vector<2x128xf32>
    %c0_99 = arith.constant 0 : index
    %c0_100 = arith.constant 0 : index
    %203 = vector.load %arg19[%c0_99, %c0_100] : memref<1x1xf32, #tpu.memory_space<vmem>>, vector<1x1xf32>
    %204 = arith.mulf %154, %202 : vector<2x128xf32>
    %205 = vector.shape_cast %204 : vector<2x128xf32> to vector<1x2x128xf32>
    %cst_101 = arith.constant dense<0.000000e+00> : vector<1xf32>
    %206 = vector.multi_reduction <add>, %205, %cst_101 [1, 2] : vector<1x2x128xf32> to vector<1xf32>
    %207 = vector.shape_cast %206 : vector<1xf32> to vector<1x1x1xf32>
    %208 = vector.extract %207[0, 0, 0] : f32 from vector<1x1x1xf32>
    %209 = vector.broadcast %208 : f32 to vector<1x1xf32>
    %210 = arith.addf %203, %209 : vector<1x1xf32>
    %c0_102 = arith.constant 0 : index
    %c0_103 = arith.constant 0 : index
    %211 = vector.load %arg19[%c0_102, %c0_103] : memref<1x1xf32, #tpu.memory_space<vmem>>, vector<1x1xf32>
    tpu.vector_store %arg19[%c0_102, %c0_103], %210 {strides = array<i32>} : memref<1x1xf32, #tpu.memory_space<vmem>>, vector<1x1xf32>,
    %c0_104 = arith.constant 0 : index
    %c0_105 = arith.constant 0 : index
    %212 = vector.load %arg20[%c0_104, %c0_105] : memref<1x1xf32, #tpu.memory_space<vmem>>, vector<1x1xf32>
    %213 = vector.shape_cast %154 : vector<2x128xf32> to vector<1x2x128xf32>
    %cst_106 = arith.constant dense<0.000000e+00> : vector<1xf32>
    %214 = vector.multi_reduction <add>, %213, %cst_106 [1, 2] : vector<1x2x128xf32> to vector<1xf32>
    %215 = vector.shape_cast %214 : vector<1xf32> to vector<1x1x1xf32>
    %216 = vector.extract %215[0, 0, 0] : f32 from vector<1x1x1xf32>
    %217 = vector.broadcast %216 : f32 to vector<1x1xf32>
    %218 = arith.addf %212, %217 : vector<1x1xf32>
    %c0_107 = arith.constant 0 : index
    %c0_108 = arith.constant 0 : index
    %219 = vector.load %arg20[%c0_107, %c0_108] : memref<1x1xf32, #tpu.memory_space<vmem>>, vector<1x1xf32>
    tpu.vector_store %arg20[%c0_107, %c0_108], %218 {strides = array<i32>} : memref<1x1xf32, #tpu.memory_space<vmem>>, vector<1x1xf32>,
    %c0_109 = arith.constant 0 : index
    %c0_110 = arith.constant 0 : index
    %220 = vector.load %arg21[%c0_109, %c0_110] : memref<1x1xf32, #tpu.memory_space<vmem>>, vector<1x1xf32>
    %221 = vector.broadcast %10 : vector<1x128xf32> to vector<2x128xf32>
    %222 = arith.mulf %202, %221 : vector<2x128xf32>
    %223 = vector.shape_cast %222 : vector<2x128xf32> to vector<1x2x128xf32>
    %cst_111 = arith.constant dense<0.000000e+00> : vector<1xf32>
    %224 = vector.multi_reduction <add>, %223, %cst_111 [1, 2] : vector<1x2x128xf32> to vector<1xf32>
    %225 = vector.shape_cast %224 : vector<1xf32> to vector<1x1x1xf32>
    %226 = vector.extract %225[0, 0, 0] : f32 from vector<1x1x1xf32>
    %227 = vector.broadcast %226 : f32 to vector<1x1xf32>
    %228 = arith.addf %220, %227 : vector<1x1xf32>
    %c0_112 = arith.constant 0 : index
    %c0_113 = arith.constant 0 : index
    %229 = vector.load %arg21[%c0_112, %c0_113] : memref<1x1xf32, #tpu.memory_space<vmem>>, vector<1x1xf32>
    tpu.vector_store %arg21[%c0_112, %c0_113], %228 {strides = array<i32>} : memref<1x1xf32, #tpu.memory_space<vmem>>, vector<1x1xf32>,
    %c0_114 = arith.constant 0 : index
    %c0_115 = arith.constant 0 : index
    %230 = vector.load %arg5[%c0_114, %c0_115] : memref<4x128xf32, #tpu.memory_space<vmem>>, vector<4x128xf32>
    %c0_116 = arith.constant 0 : index
    %c0_117 = arith.constant 0 : index
    %231 = vector.load %arg6[%c0_116, %c0_117] : memref<4x128xf32, #tpu.memory_space<vmem>>, vector<4x128xf32>
    %232 = arith.subf %230, %231 : vector<4x128xf32>
    %c0_118 = arith.constant 0 : index
    %c0_119 = arith.constant 0 : index
    %233 = vector.load %arg22[%c0_118, %c0_119] : memref<1x1xf32, #tpu.memory_space<vmem>>, vector<1x1xf32>
    %234 = arith.mulf %232, %232 : vector<4x128xf32>
    %235 = vector.shape_cast %234 : vector<4x128xf32> to vector<1x4x128xf32>
    %cst_120 = arith.constant dense<0.000000e+00> : vector<1xf32>
    %236 = vector.multi_reduction <add>, %235, %cst_120 [1, 2] : vector<1x4x128xf32> to vector<1xf32>
    %237 = vector.shape_cast %236 : vector<1xf32> to vector<1x1x1xf32>
    %238 = vector.extract %237[0, 0, 0] : f32 from vector<1x1x1xf32>
    %239 = vector.broadcast %238 : f32 to vector<1x1xf32>
    %240 = arith.addf %233, %239 : vector<1x1xf32>
    %c0_121 = arith.constant 0 : index
    %c0_122 = arith.constant 0 : index
    %241 = vector.load %arg22[%c0_121, %c0_122] : memref<1x1xf32, #tpu.memory_space<vmem>>, vector<1x1xf32>
    tpu.vector_store %arg22[%c0_121, %c0_122], %240 {strides = array<i32>} : memref<1x1xf32, #tpu.memory_space<vmem>>, vector<1x1xf32>,
    %c1_i32 = arith.constant 1 : i32
    %242 = arith.cmpi eq, %arg0, %c1_i32 : i32
    %243 = arith.extui %242 : i1 to i32
    %c0_i32_123 = arith.constant 0 : i32
    %244 = arith.cmpi ne, %243, %c0_i32_123 : i32
    scf.if %244 {
      %c0_124 = arith.constant 0 : index
      %c0_125 = arith.constant 0 : index
      %245 = vector.load %arg8[%c0_124, %c0_125] : memref<1x1xf32, #tpu.memory_space<vmem>>, vector<1x1xf32>
      %cst_126 = arith.constant 0.00240384624 : f32
      %246 = vector.broadcast %cst_126 : f32 to vector<1x1xf32>
      %247 = arith.mulf %245, %246 : vector<1x1xf32>
      %cst_127 = arith.constant 0.000000e+00 : f32
      %248 = vector.broadcast %cst_127 : f32 to vector<1x1xf32>
      %c0_128 = arith.constant 0 : index
      %c0_129 = arith.constant 0 : index
      %249 = vector.load %arg12[%c0_128, %c0_129] : memref<1x1xf32, #tpu.memory_space<vmem>>, vector<1x1xf32>
      %c0_130 = arith.constant 0 : index
      %c0_131 = arith.constant 0 : index
      %250 = vector.load %arg15[%c0_130, %c0_131] : memref<1x1xf32, #tpu.memory_space<vmem>>, vector<1x1xf32>
      %251 = arith.addf %249, %250 : vector<1x1xf32>
      %c0_132 = arith.constant 0 : index
      %c0_133 = arith.constant 0 : index
      %252 = vector.load %arg9[%c0_132, %c0_133] : memref<1x1xf32, #tpu.memory_space<vmem>>, vector<1x1xf32>
      %cst_134 = arith.constant 2.000000e+00 : f32
      %253 = vector.broadcast %cst_134 : f32 to vector<1x1xf32>
      %254 = arith.mulf %253, %252 : vector<1x1xf32>
      %cst_135 = arith.constant 1.000000e-07 : f32
      %255 = vector.broadcast %cst_135 : f32 to vector<1x1xf32>
      %256 = arith.maximumf %251, %255 : vector<1x1xf32>
      %257 = arith.divf %254, %256 : vector<1x1xf32>
      %cst_136 = arith.constant 1.000000e+00 : f32
      %258 = vector.broadcast %cst_136 : f32 to vector<1x1xf32>
      %259 = arith.subf %258, %257 : vector<1x1xf32>
      %cst_137 = arith.constant 0.000000e+00 : f32
      %260 = vector.broadcast %cst_137 : f32 to vector<1x1xf32>
      %261 = arith.cmpf ogt, %249, %260 : vector<1x1xf32>
      %262 = arith.extui %261 : vector<1x1xi1> to vector<1x1xi32>
      %263 = arith.sitofp %262 : vector<1x1xi32> to vector<1x1xf32>
      %264 = arith.mulf %259, %263 : vector<1x1xf32>
      %265 = arith.addf %248, %264 : vector<1x1xf32>
      %c0_138 = arith.constant 0 : index
      %c0_139 = arith.constant 0 : index
      %266 = vector.load %arg13[%c0_138, %c0_139] : memref<1x1xf32, #tpu.memory_space<vmem>>, vector<1x1xf32>
      %c0_140 = arith.constant 0 : index
      %c0_141 = arith.constant 0 : index
      %267 = vector.load %arg16[%c0_140, %c0_141] : memref<1x1xf32, #tpu.memory_space<vmem>>, vector<1x1xf32>
      %268 = arith.addf %266, %267 : vector<1x1xf32>
      %c0_142 = arith.constant 0 : index
      %c0_143 = arith.constant 0 : index
      %269 = vector.load %arg10[%c0_142, %c0_143] : memref<1x1xf32, #tpu.memory_space<vmem>>, vector<1x1xf32>
      %cst_144 = arith.constant 2.000000e+00 : f32
      %270 = vector.broadcast %cst_144 : f32 to vector<1x1xf32>
      %271 = arith.mulf %270, %269 : vector<1x1xf32>
      %cst_145 = arith.constant 1.000000e-07 : f32
      %272 = vector.broadcast %cst_145 : f32 to vector<1x1xf32>
      %273 = arith.maximumf %268, %272 : vector<1x1xf32>
      %274 = arith.divf %271, %273 : vector<1x1xf32>
      %cst_146 = arith.constant 1.000000e+00 : f32
      %275 = vector.broadcast %cst_146 : f32 to vector<1x1xf32>
      %276 = arith.subf %275, %274 : vector<1x1xf32>
      %cst_147 = arith.constant 0.000000e+00 : f32
      %277 = vector.broadcast %cst_147 : f32 to vector<1x1xf32>
      %278 = arith.cmpf ogt, %266, %277 : vector<1x1xf32>
      %279 = arith.extui %278 : vector<1x1xi1> to vector<1x1xi32>
      %280 = arith.sitofp %279 : vector<1x1xi32> to vector<1x1xf32>
      %281 = arith.mulf %276, %280 : vector<1x1xf32>
      %282 = arith.addf %265, %281 : vector<1x1xf32>
      %c0_148 = arith.constant 0 : index
      %c0_149 = arith.constant 0 : index
      %283 = vector.load %arg14[%c0_148, %c0_149] : memref<1x1xf32, #tpu.memory_space<vmem>>, vector<1x1xf32>
      %c0_150 = arith.constant 0 : index
      %c0_151 = arith.constant 0 : index
      %284 = vector.load %arg17[%c0_150, %c0_151] : memref<1x1xf32, #tpu.memory_space<vmem>>, vector<1x1xf32>
      %285 = arith.addf %283, %284 : vector<1x1xf32>
      %c0_152 = arith.constant 0 : index
      %c0_153 = arith.constant 0 : index
      %286 = vector.load %arg11[%c0_152, %c0_153] : memref<1x1xf32, #tpu.memory_space<vmem>>, vector<1x1xf32>
      %cst_154 = arith.constant 2.000000e+00 : f32
      %287 = vector.broadcast %cst_154 : f32 to vector<1x1xf32>
      %288 = arith.mulf %287, %286 : vector<1x1xf32>
      %cst_155 = arith.constant 1.000000e-07 : f32
      %289 = vector.broadcast %cst_155 : f32 to vector<1x1xf32>
      %290 = arith.maximumf %285, %289 : vector<1x1xf32>
      %291 = arith.divf %288, %290 : vector<1x1xf32>
      %cst_156 = arith.constant 1.000000e+00 : f32
      %292 = vector.broadcast %cst_156 : f32 to vector<1x1xf32>
      %293 = arith.subf %292, %291 : vector<1x1xf32>
      %cst_157 = arith.constant 0.000000e+00 : f32
      %294 = vector.broadcast %cst_157 : f32 to vector<1x1xf32>
      %295 = arith.cmpf ogt, %283, %294 : vector<1x1xf32>
      %296 = arith.extui %295 : vector<1x1xi1> to vector<1x1xi32>
      %297 = arith.sitofp %296 : vector<1x1xi32> to vector<1x1xf32>
      %298 = arith.mulf %293, %297 : vector<1x1xf32>
      %299 = arith.addf %282, %298 : vector<1x1xf32>
      %cst_158 = arith.constant 0.333333343 : f32
      %300 = vector.broadcast %cst_158 : f32 to vector<1x1xf32>
      %301 = arith.mulf %299, %300 : vector<1x1xf32>
      %c0_159 = arith.constant 0 : index
      %c0_160 = arith.constant 0 : index
      %302 = vector.load %arg18[%c0_159, %c0_160] : memref<1x1xf32, #tpu.memory_space<vmem>>, vector<1x1xf32>
      %cst_161 = arith.constant 0.00240384624 : f32
      %303 = vector.broadcast %cst_161 : f32 to vector<1x1xf32>
      %304 = arith.mulf %302, %303 : vector<1x1xf32>
      %cst_162 = arith.constant 0.000000e+00 : f32
      %305 = vector.broadcast %cst_162 : f32 to vector<1x1xf32>
      %c0_163 = arith.constant 0 : index
      %c0_164 = arith.constant 0 : index
      %306 = vector.load %arg20[%c0_163, %c0_164] : memref<1x1xf32, #tpu.memory_space<vmem>>, vector<1x1xf32>
      %c0_165 = arith.constant 0 : index
      %c0_166 = arith.constant 0 : index
      %307 = vector.load %arg21[%c0_165, %c0_166] : memref<1x1xf32, #tpu.memory_space<vmem>>, vector<1x1xf32>
      %308 = arith.addf %306, %307 : vector<1x1xf32>
      %c0_167 = arith.constant 0 : index
      %c0_168 = arith.constant 0 : index
      %309 = vector.load %arg19[%c0_167, %c0_168] : memref<1x1xf32, #tpu.memory_space<vmem>>, vector<1x1xf32>
      %cst_169 = arith.constant 2.000000e+00 : f32
      %310 = vector.broadcast %cst_169 : f32 to vector<1x1xf32>
      %311 = arith.mulf %310, %309 : vector<1x1xf32>
      %cst_170 = arith.constant 1.000000e-07 : f32
      %312 = vector.broadcast %cst_170 : f32 to vector<1x1xf32>
      %313 = arith.maximumf %308, %312 : vector<1x1xf32>
      %314 = arith.divf %311, %313 : vector<1x1xf32>
      %cst_171 = arith.constant 1.000000e+00 : f32
      %315 = vector.broadcast %cst_171 : f32 to vector<1x1xf32>
      %316 = arith.subf %315, %314 : vector<1x1xf32>
      %cst_172 = arith.constant 0.000000e+00 : f32
      %317 = vector.broadcast %cst_172 : f32 to vector<1x1xf32>
      %318 = arith.cmpf ogt, %306, %317 : vector<1x1xf32>
      %319 = arith.extui %318 : vector<1x1xi1> to vector<1x1xi32>
      %320 = arith.sitofp %319 : vector<1x1xi32> to vector<1x1xf32>
      %321 = arith.mulf %316, %320 : vector<1x1xf32>
      %322 = arith.addf %305, %321 : vector<1x1xf32>
      %cst_173 = arith.constant 1.000000e+00 : f32
      %323 = vector.broadcast %cst_173 : f32 to vector<1x1xf32>
      %324 = arith.mulf %322, %323 : vector<1x1xf32>
      %c0_174 = arith.constant 0 : index
      %c0_175 = arith.constant 0 : index
      %325 = vector.load %arg22[%c0_174, %c0_175] : memref<1x1xf32, #tpu.memory_space<vmem>>, vector<1x1xf32>
      %cst_176 = arith.constant 0.00120192312 : f32
      %326 = vector.broadcast %cst_176 : f32 to vector<1x1xf32>
      %327 = arith.mulf %325, %326 : vector<1x1xf32>
      %328 = arith.addf %247, %301 : vector<1x1xf32>
      %329 = arith.addf %328, %304 : vector<1x1xf32>
      %330 = arith.addf %329, %324 : vector<1x1xf32>
      %331 = arith.addf %330, %327 : vector<1x1xf32>
      %c0_177 = arith.constant 0 : index
      %c0_178 = arith.constant 0 : index
      %332 = vector.load %arg7[%c0_177, %c0_178] : memref<1x1xf32, #tpu.memory_space<vmem>>, vector<1x1xf32>
      tpu.vector_store %arg7[%c0_177, %c0_178], %331 {strides = array<i32>} : memref<1x1xf32, #tpu.memory_space<vmem>>, vector<1x1xf32>,
    } else {
    }
    return
  }
  func.func @transform_0(%arg0: i32) -> (i32, i32) {
    %c0_i32 = arith.constant 0 : i32
    %c0_i32_0 = arith.constant 0 : i32
    return %c0_i32, %arg0 : i32, i32
  }
  func.func @transform_1(%arg0: i32) -> (i32, i32) {
    %c0_i32 = arith.constant 0 : i32
    %c0_i32_0 = arith.constant 0 : i32
    return %c0_i32, %arg0 : i32, i32
  }
  func.func @transform_2(%arg0: i32) -> (i32, i32) {
    %c0_i32 = arith.constant 0 : i32
    %c0_i32_0 = arith.constant 0 : i32
    return %c0_i32, %arg0 : i32, i32
  }
  func.func @transform_3(%arg0: i32) -> (i32, i32) {
    %c0_i32 = arith.constant 0 : i32
    %c0_i32_0 = arith.constant 0 : i32
    return %c0_i32, %arg0 : i32, i32
  }
  func.func @transform_4(%arg0: i32) -> (i32, i32) {
    %c0_i32 = arith.constant 0 : i32
    %c0_i32_0 = arith.constant 0 : i32
    return %c0_i32, %arg0 : i32, i32
  }
  func.func @transform_5(%arg0: i32) -> (i32, i32) {
    %c0_i32 = arith.constant 0 : i32
    %c0_i32_0 = arith.constant 0 : i32
    return %c0_i32, %arg0 : i32, i32
  }
  func.func @transform_6(%arg0: i32) -> (i32, i32) {
    %c0_i32 = arith.constant 0 : i32
    %c0_i32_0 = arith.constant 0 : i32
    %c0_i32_1 = arith.constant 0 : i32
    return %c0_i32, %c0_i32_0 : i32, i32
  }
}

</mosaic_0001>

<bundles_post_ra>
// kernel: cell_det_seg_poi_loss.1
= control target key start
LH: loop header
LB: loop body
LE: loop exit
PB: predicated region body
PF: predicated region fallthrough
CT: control target
= control target key end

     0   :  { %11 = vsyncpa [#allocation18], 0  ;;  %s1003_s21 = smov 0   ;;  %s1183_s0 = inlined_call_operand.vmem [shape: f32[6,256], index: 0, kind: input, shape index: {}]   ;;  %s1184_s1 = inlined_call_operand.vmem [shape: f32[6,256], index: 1, kind: input, shape index: {}]   ;;  %s1185_s2 = inlined_call_operand.vmem [shape: f32[2,256], index: 2, kind: input, shape index: {}]   ;;  %s1186_s3 = inlined_call_operand.vmem [shape: f32[2,256], index: 3, kind: input, shape index: {}]   ;;  %s1187_s4 = inlined_call_operand.vmem [shape: f32[4,256], index: 4, kind: input, shape index: {}]   ;;  %s1188_s5 = inlined_call_operand.vmem [shape: f32[4,256], index: 5, kind: input, shape index: {}]   ;;  %s1189_s6 = inlined_call_operand.hbm [shape: f32[1,1], index: 6, kind: output, shape index: {}]  }
   0x1 LB: > { %s1009_s22 = sadd.s32 4294967295, %s962_s21   ;;  %p831_p0 = scmp.ge.s32.totalorder %s962_s21, 1  ;;  %s962_s21 = sphi %s1003_s21, %s17_s21  }
   0x2   : > { %p252_p1 = scmp.lt.s32.totalorder %s962_s21, 3 }
   0x4   : > { %p253_p2 = pnand %p831_p0, %p252_p1 }
   0x5   : > { %p296_p3 = scmp.lt.s32.totalorder (!%p253_p2), %s1009_s22, 1  ;;  %p838_p4 = scmp.ne.s32.totalorder (!%p253_p2), %s1009_s22, 0 }
   0x6   : > { %256 = sbr.rel (%p253_p2) target bundleno = 368 (0x170), region = 44 }
   0xd   : > { %s297_s23 = scalar_select %p296_p3, %s1009_s22, 1 }
   0xe   : > { %323 = sbr.rel (%p838_p4) target bundleno = 23 (0x17), region = 48  ;;  %vm324_vm0 = vcmask (!%p838_p4), 0   ;;  %v964_v0 = vmov (!%p838_p4), 0.0  }
   0xf   : > { %s832_s24 = sshll.u32 %s297_s23, 3  ;;  %s834_s25 = sshll.u32 %s297_s23, 1  ;;  %325 = vst.msk [vmem:[#allocation2] sm:$0x1] (!%p838_p4), %vm324_vm0, %v964_v0  ;;  %326 = vst.msk [vmem:[#allocation3] sm:$0x1] (!%p838_p4), %vm324_vm0, %v964_v0 }
  0x10   : > { %s1018_s28 = scalar_lea.vmem %s1183_s0, %s832_s24  ;;  %s1023_s7 = scalar_lea.vmem %s1184_s1, %s832_s24  ;;  %327 = vst.msk [vmem:[#allocation4] sm:$0x1] (!%p838_p4), %vm324_vm0, %v964_v0  ;;  %328 = vst.msk [vmem:[#allocation5] sm:$0x1] (!%p838_p4), %vm324_vm0, %v964_v0 }
  0x11   : > { %s1028_s10 = scalar_lea.vmem %s1185_s2, %s834_s25  ;;  %s1033_s13 = scalar_lea.vmem %s1186_s3, %s834_s25  ;;  %329 = vst.msk [vmem:[#allocation6] sm:$0x1] (!%p838_p4), %vm324_vm0, %v964_v0  ;;  %330 = vst.msk [vmem:[#allocation7] sm:$0x1] (!%p838_p4), %vm324_vm0, %v964_v0 }
  0x12   : > { %s836_s14 = sshll.u32 %s297_s23, 2  ;;  %331 = vst.msk [vmem:[#allocation8] sm:$0x1] (!%p838_p4), %vm324_vm0, %v964_v0  ;;  %332 = vst.msk [vmem:[#allocation9] sm:$0x1] (!%p838_p4), %vm324_vm0, %v964_v0 }
  0x13   : > { %s1038_s17 = scalar_lea.vmem %s1187_s4, %s836_s14  ;;  %s1043_s20 = scalar_lea.vmem %s1188_s5, %s836_s14  ;;  %333 = vst.msk [vmem:[#allocation10] sm:$0x1] (!%p838_p4), %vm324_vm0, %v964_v0  ;;  %334 = vst.msk [vmem:[#allocation11] sm:$0x1] (!%p838_p4), %vm324_vm0, %v964_v0 }
  0x14   : > { %335 = vst.msk [vmem:[#allocation12] sm:$0x1] (!%p838_p4), %vm324_vm0, %v964_v0  ;;  %336 = vst.msk [vmem:[#allocation13] sm:$0x1] (!%p838_p4), %vm324_vm0, %v964_v0 }
  0x15   : > { %337 = vst.msk [vmem:[#allocation14] sm:$0x1] %vm324_vm0, %v964_v0  ;;  %338 = vst.msk [vmem:[#allocation15] sm:$0x1] %vm324_vm0, %v964_v0 }
  0x16   : > { %339 = vst.msk [vmem:[#allocation16] sm:$0x1] %vm324_vm0, %v964_v0 }
  0x17 PF: > { %v1062_v1 = vld [vmem:[%s1023_s7] sm:$0x3]  ;;  %vm374_vm1 = vcmask 1041408   ;;  %v349_v4 = vld [vmem:[%s1018_s28 + $0x2] sm:$0x3]  ;;  %v341_v29 = vlaneseq  ;;  %s839_s23 = sshll.u32 %s1009_s22, 7 }
  0x18   : > { %v348_v2 = vld [vmem:[%s1018_s28] sm:$0x3]  ;;  %v390_v3 = vsel %vm374_vm1, %v1062_v1, 0.0  ;;  %v351_v5 = vld [vmem:[%s1018_s28 + $0x4] sm:$0x3]  ;;  %v343_v32 = vstv %s839_s23  ;;  %v965_v50 = vmov 0.0  }
  0x19   : > { %391 = vadd.xlane.f32.xlu0 %v390_v3  ;;  %v350_v6 = vmax.f32 %v348_v2, %v349_v4  ;;  %v1070_v7 = vld [vmem:[%s1023_s7 + $0x4] sm:$0x3]  ;;  %v1077_v10 = vld [vmem:[%s1023_s7 + $0x2] sm:$0x3]  ;;  %v543_v11 = vld [vmem:[%s1028_s10] sm:$0x3] }
  0x1a   : > { %v494_v8 = vsel %vm374_vm1, %v1070_v7, 0.0  ;;  %v442_v12 = vsel %vm374_vm1, %v1077_v10, 0.0  ;;  %v545_v13 = vsub.f32 0.0, %v543_v11  ;;  %v1088_v17 = vld [vmem:[%s1033_s13] sm:$0x3]  ;;  %v342_v31 = vand.u32 127, %v341_v29 }
  0x1b   : > { %v1074_v9 = vmax.f32 %v350_v6, %v351_v5  ;;  %495 = vadd.xlane.f32.xlu1 %v494_v8  ;;  %v603_v19 = vsel %vm374_vm1, %v1088_v17, 0.0  ;;  %v470_v35 = vld [vmem:[%s1018_s28 + $0x4] sm:$0x3]  ;;  %v418_v36 = vld [vmem:[%s1018_s28 + $0x2] sm:$0x3]  ;;  %vm636_vm3 = vcmask 1043456  }
  0x1c   : > { %v546_v18 = vmul.f32 1.442695, %v545_v13  ;;  %v344_v33 = vadd.s32 %v343_v32, %v342_v31  ;;  %v369_v44 = vmul.f32 0.6, %v1062_v1  ;;  %v474_v45 = vmul.f32 0.2, %v1070_v7 }
  0x1d   : > { %v1083_v14 = vsub.f32 %v348_v2, %v1074_v9  ;;  %v356_v15 = vsub.f32 %v349_v4, %v1074_v9  ;;  %v360_v16 = vsub.f32 %v351_v5, %v1074_v9  ;;  %443 = vadd.xlane.f32.xlu0 %v442_v12  ;;  %v472_v40 = vsub.f32 %v470_v35, %v1074_v9  ;;  %p841_p5 = scmp.ne.s32.totalorder %s1009_s22, 1 }
  0x1e   : > { %898 = vpow2.f32 %v546_v18  ;;  %vm345_vm2 = vcmp.lt.s32.totalorder %v344_v33, 208  ;;  %v420_v41 = vsub.f32 %v418_v36, %v1074_v9  ;;  %v422_v49 = vmul.f32 0.2, %v1077_v10  ;;  %v631_v33 = vld [vmem:[%s1038_s17] sm:$0xf] }
  0x1f   : > { %v354_v20 = vmul.f32 1.442695, %v1083_v14  ;;  %v357_v21 = vmul.f32 1.442695, %v356_v15  ;;  %v361_v22 = vmul.f32 1.442695, %v360_v16 }
  0x20   : > { %v1106_v51 = vsel %vm345_vm2, 1.0, %v965_v50  ;;  %v557_v5 = vsub.f32 1.0, %v1088_v17  ;;  %vm387_vm4 = vcmask 0  }
  0x21   : > { %900 = vpow2.f32 %v354_v20  ;;  %604 = vadd.xlane.f32.xlu0 %v603_v19 }
  0x22   : > { %902 = vpow2.f32 %v357_v21  ;;  %v566_v29 = vmul.f32 0.75, %v557_v5 }
  0x23   : > { %904 = vpow2.f32 %v361_v22 }
  0x28   : > { %v899_v23 = vpop.eup %898 }
  0x29   : > { %v548_v25 = vadd.f32 1.0, %v899_v23 }
  0x2b   : > { %v901_v24 = vpop.eup %900  ;;  %906 = vlog2.f32 %v548_v25 }
  0x2c   : > { %v903_v26 = vpop.eup %902  ;;  %908 = vrcp.f32 %v548_v25 }
  0x2d   : > { %v905_v27 = vpop.eup %904  ;;  %v359_v28 = vadd.f32 %v903_v26, %v901_v24 }
  0x2f   : > { %v363_v30 = vadd.f32 %v905_v27, %v359_v28  ;;  %v565_v28 = vmul.f32 0.25, %v1088_v17 }
  0x31   : > { %910 = vlog2.f32 %v363_v30  ;;  %v567_v36 = vadd.f32 %v566_v29, %v565_v28 }
  0x32   : > { %912 = vrcp.f32 %v363_v30 }
  0x35   : > { %v907_v34 = vpop.eup %906 }
  0x36   : > { %v1096_v37 = vpop.eup %908  ;;  %v550_v38 = vmul.f32 0.6931472, %v907_v34  ;;  %v632_v34 = vld [vmem:[%s1043_s20] sm:$0xf] }
  0x37   : > { %v588_v39 = vmul.f32 %v1096_v37, %v1088_v17 }
  0x38   : > { %v551_v42 = vsub.f32 0.0, %v550_v38 }
  0x39   : > { %v589_v46 = vsel %vm374_vm1, %v588_v39, 0.0  ;;  %v617_v39 = vmul.f32 %v1096_v37, %v1106_v51 }
  0x3a   : > { %590 = vadd.xlane.f32.xlu1 %v589_v46  ;;  %v553_v52 = vsub.f32 %v551_v42, %v543_v11  ;;  %v552_v56 = vmax.f32 %v551_v42, -100.0  ;;  %v633_v42 = vsub.f32 %v631_v33, %v632_v34 }
  0x3b   : > { %v911_v43 = vpop.eup %910 }
  0x3c   : > { %v913_v47 = vpop.eup %912  ;;  %v365_v48 = vmul.f32 0.6931472, %v911_v43  ;;  %v554_v60 = vmin.f32 %v553_v52, 0.0  ;;  %v556_v13 = vmul.f32 %v552_v56, %v1088_v17  ;;  %v618_v17 = vsel %vm374_vm1, %v617_v39, 0.0 }
  0x3d   : > { %v371_v53 = vmul.f32 %v913_v47, %v901_v24  ;;  %v425_v54 = vmul.f32 %v913_v47, %v903_v26  ;;  %v477_v55 = vmul.f32 %v913_v47, %v905_v27 }
  0x3e   : > { %v368_v57 = vsub.f32 %v1083_v14, %v365_v48  ;;  %v473_v58 = vsub.f32 %v472_v40, %v365_v48  ;;  %v421_v59 = vsub.f32 %v420_v41, %v365_v48  ;;  %v555_v12 = vmax.f32 %v554_v60, -100.0 }
  0x3f   : > { %v404_v61 = vmul.f32 %v1106_v51, %v371_v53  ;;  %v373_v62 = vmul.f32 %v371_v53, %v1062_v1  ;;  %v427_v63 = vmul.f32 %v425_v54, %v1077_v10  ;;  %v479_v0 = vmul.f32 %v477_v55, %v1070_v7 }
  0x40   : > { %v370_v2 = vmul.f32 %v369_v44, %v368_v57  ;;  %v475_v3 = vmul.f32 %v474_v45, %v473_v58  ;;  %v423_v4 = vmul.f32 %v422_v49, %v421_v59  ;;  %v456_v9 = vmul.f32 %v1106_v51, %v425_v54 }
  0x41   : > { %v405_v6 = vsel %vm374_vm1, %v404_v61, 0.0  ;;  %v375_v8 = vsel %vm374_vm1, %v373_v62, 0.0  ;;  %v428_v1 = vsel %vm374_vm1, %v427_v63, 0.0  ;;  %v480_v10 = vsel %vm374_vm1, %v479_v0, 0.0 }
  0x42   : > { %406 = vadd.xlane.f32.xlu1 %v405_v6  ;;  %376 = vadd.xlane.f32.xlu0 %v375_v8  ;;  %v424_v11 = vadd.f32 %v423_v4, %v370_v2  ;;  %v508_v7 = vmul.f32 %v1106_v51, %v477_v55  ;;  %v558_v15 = vmul.f32 %v557_v5, %v555_v12  ;;  %v457_v19 = vsel %vm374_vm1, %v456_v9, 0.0 }
  0x43   : > { %v635_v45 = vmul.f32 %v633_v42, %v633_v42 }
  0x44   : > { %v476_v14 = vadd.f32 %v475_v3, %v424_v11  ;;  %v559_v18 = vadd.f32 %v558_v15, %v556_v13  ;;  %v509_v20 = vsel %vm374_vm1, %v508_v7, 0.0 }
  0x45   : > { %v637_v47 = vsel %vm636_vm3, %v635_v45, 0.0 }
  0x46   : > { %429 = vadd.xlane.f32.xlu1 %v428_v1  ;;  %481 = vadd.xlane.f32.xlu0 %v480_v10  ;;  %v522_v16 = vsub.f32 0.0, %v476_v14  ;;  %v560_v22 = vsub.f32 0.0, %v559_v18 }
  0x48   : > { %v523_v21 = vsub.f32 0.0, %v522_v16  ;;  %v561_v24 = vsub.f32 0.0, %v560_v22 }
  0x4a   : > { %458 = vadd.xlane.f32.xlu1 %v457_v19  ;;  %510 = vadd.xlane.f32.xlu0 %v509_v20  ;;  %v524_v23 = vmul.f32 1.442695, %v523_v21  ;;  %v562_v25 = vmul.f32 1.442695, %v561_v24 }
  0x4c   : > { %914 = vpow2.f32 %v524_v23 }
  0x4d   : > { %916 = vpow2.f32 %v562_v25 }
  0x56   : > { %v915_v26 = vpop.eup %914 }
  0x57   : > { %v526_v27 = vsub.f32 1.0, %v915_v26  ;;  %v917_v30 = vpop.eup %916 }
  0x58   : > { %v564_v32 = vsub.f32 1.0, %v917_v30 }
  0x59   : > { %v528_v31 = vmul.f32 %v526_v27, %v526_v27 }
  0x5a   : > { %v569_v38 = vmul.f32 %v564_v32, %v564_v32 }
  0x5b   : > { %v529_v35 = vmul.f32 %v528_v31, %v522_v16 }
  0x5c   : > { %v570_v41 = vmul.f32 %v569_v38, %v560_v22 }
  0x5d   : > { %v530_v40 = vsel %vm374_vm1, %v529_v35, 0.0 }
  0x5e   : > { %531 = vadd.xlane.f32.xlu1 %v530_v40  ;;  %v571_v43 = vmul.f32 %v570_v41, %v567_v36 }
  0x60   : > { %v572_v44 = vmul.f32 %v1106_v51, %v571_v43 }
  0x62   : > { %619 = vadd.xlane.f32.xlu1 %v618_v17  ;;  %v573_v46 = vsel %vm374_vm1, %v572_v44, 0.0 }
  0x63   : > { %574 = vadd.xlane.f32.xlu0 %v573_v46 }
  0x67   : > { %638 = vadd.xlane.f32.xlu0 %v637_v47 }
  0xa6   : > { %v392_v48 = vpop.xlane.xlu0 %391 }
  0xa7   : > { %v393_v50 = vrot.slane %v392_v48, 4 }
  0xa8   : > { %v496_v37 = vpop.xlane.xlu1 %495 }
  0xa9   : > { %v394_v52 = vadd.f32 %v393_v50, %v392_v48  ;;  %v497_v57 = vrot.slane %v496_v37, 4 }
  0xaa   : > { %v444_v49 = vpop.xlane.xlu0 %443 }
  0xab   : > { %v445_v53 = vrot.slane %v444_v49, 4  ;;  %v395_v56 = vrot.slane %v394_v52, 2  ;;  %v498_v3 = vadd.f32 %v497_v57, %v496_v37 }
  0xad   : > { %v446_v51 = vadd.f32 %v445_v53, %v444_v49  ;;  %v396_v63 = vadd.f32 %v395_v56, %v394_v52  ;;  %v499_v15 = vrot.slane %v498_v3, 2 }
  0xae   : > { %v1134_v55 = vpop.xlane.xlu0 %604 }
  0xaf   : > { %v447_v62 = vrot.slane %v446_v51, 2  ;;  %v397_v12 = vrot.slane %v396_v63, 1  ;;  %v500_v35 = vadd.f32 %v499_v15, %v498_v3  ;;  %v606_v49 = vrot.slane %v1134_v55, 4 }
  0xb1   : > { %v448_v1 = vadd.f32 %v447_v62, %v446_v51  ;;  %v398_v23 = vadd.f32 %v397_v12, %v396_v63  ;;  %v501_v17 = vrot.slane %v500_v35, 1  ;;  %v607_v56 = vadd.f32 %v606_v49, %v1134_v55 }
  0xb3   : > { %v449_v25 = vrot.slane %v448_v1, 1  ;;  %v502_v48 = vadd.f32 %v501_v17, %v500_v35  ;;  %v441_v35 = vld [vmem:[#allocation7] sm:$0x1]  ;;  %v493_v17 = vld [vmem:[#allocation8] sm:$0x1] }
  0xb5   : > { %v450_v36 = vadd.f32 %v449_v25, %v448_v1  ;;  %v372_v25 = vld [vmem:[#allocation3] sm:$0x1] }
  0xc7   : > { %v1132_v54 = vpop.xlane.xlu1 %590 }
  0xc8   : > { %v592_v37 = vrot.slane %v1132_v54, 4 }
  0xca   : > { %v593_v53 = vadd.f32 %v592_v37, %v1132_v54 }
  0xcf   : > { %v407_v58 = vpop.xlane.xlu1 %406  ;;  %v377_v59 = vpop.xlane.xlu0 %376 }
  0xd0   : > { %v408_v60 = vrot.slane %v407_v58, 4  ;;  %v378_v61 = vrot.slane %v377_v59, 4 }
  0xd2   : > { %v409_v0 = vadd.f32 %v408_v60, %v407_v58  ;;  %v379_v2 = vadd.f32 %v378_v61, %v377_v59  ;;  %v594_v60 = vrot.slane %v593_v53, 2  ;;  %v608_v61 = vrot.slane %v607_v56, 2 }
  0xd3   : > { %v430_v4 = vpop.xlane.xlu1 %429  ;;  %v482_v5 = vpop.xlane.xlu0 %481 }
  0xd4   : > { %v410_v6 = vrot.slane %v409_v0, 2  ;;  %v380_v8 = vrot.slane %v379_v2, 2  ;;  %v431_v9 = vrot.slane %v430_v4, 4  ;;  %v483_v11 = vrot.slane %v482_v5, 4 }
  0xd6   : > { %v432_v10 = vadd.f32 %v431_v9, %v430_v4  ;;  %v484_v7 = vadd.f32 %v483_v11, %v482_v5  ;;  %v381_v13 = vadd.f32 %v380_v8, %v379_v2  ;;  %v411_v14 = vadd.f32 %v410_v6, %v409_v0 }
  0xd7   : > { %v459_v16 = vpop.xlane.xlu1 %458  ;;  %v511_v18 = vpop.xlane.xlu0 %510  ;;  %v595_v8 = vadd.f32 %v594_v60, %v593_v53  ;;  %v609_v9 = vadd.f32 %v608_v61, %v607_v56 }
  0xd8   : > { %v433_v19 = vrot.slane %v432_v10, 2  ;;  %v485_v20 = vrot.slane %v484_v7, 2  ;;  %v460_v21 = vrot.slane %v459_v16, 4  ;;  %v382_v22 = vrot.slane %v381_v13, 1 }
  0xd9   : > { %v412_v24 = vrot.slane %v411_v14, 1  ;;  %v512_v26 = vrot.slane %v511_v18, 4 }
  0xda   : > { %v461_v27 = vadd.f32 %v460_v21, %v459_v16  ;;  %v383_v28 = vadd.f32 %v382_v22, %v381_v13  ;;  %v434_v29 = vadd.f32 %v433_v19, %v432_v10  ;;  %v486_v30 = vadd.f32 %v485_v20, %v484_v7 }
  0xdb   : > { %v413_v31 = vadd.f32 %v412_v24, %v411_v14  ;;  %v513_v32 = vadd.f32 %v512_v26, %v511_v18  ;;  %v596_v7 = vrot.slane %v595_v8, 1  ;;  %v610_v16 = vrot.slane %v609_v9, 1  ;;  %v389_v26 = vld [vmem:[#allocation6] sm:$0x1] }
  0xdc   : > { %v462_v33 = vrot.slane %v461_v27, 2  ;;  %850 = vpush %v383_v28  ;;  %v435_v34 = vrot.slane %v434_v29, 1  ;;  %v487_v39 = vrot.slane %v486_v30, 1  ;;  %v403_v28 = vld [vmem:[#allocation9] sm:$0x1] }
  0xdd   : > { %852 = vpush %v398_v23  ;;  %v514_v38 = vrot.slane %v513_v32, 2  ;;  %v597_v20 = vadd.f32 %v596_v7, %v595_v8  ;;  %v611_v22 = vadd.f32 %v610_v16, %v609_v9 }
  0xde   : > { %854 = vpush %v413_v31  ;;  %v436_v40 = vadd.f32 %v435_v34, %v434_v29  ;;  %v463_v41 = vadd.f32 %v462_v33, %v461_v27  ;;  %v488_v44 = vadd.f32 %v487_v39, %v486_v30  ;;  %v426_v33 = vld [vmem:[#allocation4] sm:$0x1] }
  0xdf   : > { %v515_v42 = vadd.f32 %v514_v38, %v513_v32 }
  0xe0   : > { %856 = vpush %v436_v40  ;;  %v464_v43 = vrot.slane %v463_v41, 1 }
  0xe1   : > { %858 = vpush %v450_v36  ;;  %v516_v45 = vrot.slane %v515_v42, 1 }
  0xe2   : > { %v465_v46 = vadd.f32 %v464_v43, %v463_v41  ;;  %v455_v41 = vld [vmem:[#allocation10] sm:$0x1] }
  0xe3   : > { %v517_v47 = vadd.f32 %v516_v45, %v515_v42  ;;  %v478_v42 = vld [vmem:[#allocation5] sm:$0x1] }
  0xe4   : > { %860 = vpush %v465_v46  ;;  %v507_v46 = vld [vmem:[#allocation11] sm:$0x1] }
  0xe5   : > { %862 = vpush %v488_v44 }
  0xe6   : > { %864 = vpush %v502_v48 }
  0xe7   : > { %866 = vpush %v517_v47 }
  0xeb   : > { %v532_v50 = vpop.xlane.xlu1 %531 }
  0xec   : > { %v533_v52 = vrot.slane %v532_v50, 4 }
  0xee   : > { %v534_v51 = vadd.f32 %v533_v52, %v532_v50  ;;  %v527_v52 = vld [vmem:[#allocation2] sm:$0x1] }
  0xef   : > { %v620_v57 = vpop.xlane.xlu1 %619 }
  0xf0   : > { %v535_v58 = vrot.slane %v534_v51, 2  ;;  %v621_v59 = vrot.slane %v620_v57, 4  ;;  %v575_v62 = vpop.xlane.xlu0 %574 }
  0xf1   : > { %v576_v63 = vrot.slane %v575_v62, 4 }
  0xf2   : > { %v622_v0 = vadd.f32 %v621_v59, %v620_v57  ;;  %v536_v2 = vadd.f32 %v535_v58, %v534_v51  ;;  %v568_v51 = vld [vmem:[#allocation12] sm:$0x1]  ;;  %v587_v57 = vld [vmem:[#allocation13] sm:$0x1]  ;;  %v602_v59 = vld [vmem:[#allocation14] sm:$0x1] }
  0xf3   : > { %v577_v3 = vadd.f32 %v576_v63, %v575_v62  ;;  %v616_v62 = vld [vmem:[#allocation15] sm:$0x1] }
  0xf4   : > { %v623_v4 = vrot.slane %v622_v0, 2  ;;  %v537_v5 = vrot.slane %v536_v2, 1  ;;  %v639_v6 = vpop.xlane.xlu0 %638 }
  0xf5   : > { %v578_v11 = vrot.slane %v577_v3, 2  ;;  %v640_v12 = vrot.slane %v639_v6, 4 }
  0xf6   : > { %v624_v54 = vadd.f32 %v623_v4, %v622_v0  ;;  %v538_v55 = vadd.f32 %v537_v5, %v536_v2  ;;  %v634_v2 = vld [vmem:[#allocation16] sm:$0x1] }
  0xf7   : > { %v641_v1 = vadd.f32 %v640_v12, %v639_v6  ;;  %v579_v10 = vadd.f32 %v578_v11, %v577_v3 }
  0xf8   : > { %868 = vpush %v538_v55  ;;  %v625_v13 = vrot.slane %v624_v54, 1 }
  0xf9   : > { %v642_v14 = vrot.slane %v641_v1, 2  ;;  %v580_v15 = vrot.slane %v579_v10, 1 }
  0xfa   : > { %v626_v21 = vadd.f32 %v625_v13, %v624_v54 }
  0xfb   : > { %v643_v18 = vadd.f32 %v642_v14, %v641_v1  ;;  %v581_v19 = vadd.f32 %v580_v15, %v579_v10 }
  0xfd   : > { %870 = vpush %v581_v19  ;;  %v644_v23 = vrot.slane %v643_v18, 1 }
  0xfe   : > { %872 = vpush %v597_v20 }
  0xff   : > { %874 = vpush %v611_v22  ;;  %v645_v24 = vadd.f32 %v644_v23, %v643_v18 }
 0x100   : > { %876 = vpush %v626_v21 }
 0x101   : > { %878 = vpush %v645_v24 }
 0x10d   : > { %s851_s24 = spop %850 }
 0x10e   : > { %v385_v27 = vstv %s851_s24  ;;  %s853_s25 = spop %852 }
 0x10f   : > { %v386_v29 = vadd.f32 %v385_v27, %v372_v25  ;;  %v400_v30 = vstv %s853_s25  ;;  %s855_s26 = spop %854 }
 0x110   : > { %v401_v31 = vadd.f32 %v400_v30, %v389_v26  ;;  %v415_v32 = vstv %s855_s26 }
 0x111   : > { %388 = vst.msk [vmem:[#allocation3] sm:$0x1] %vm387_vm4, %v386_v29  ;;  %v416_v34 = vadd.f32 %v415_v32, %v403_v28  ;;  %s857_s27 = spop %856  ;;  %v966_v32 = vmov (!%p841_p5), 0.0  }
 0x112   : > { %402 = vst.msk [vmem:[#allocation6] sm:$0x1] %vm387_vm4, %v401_v31  ;;  %v438_v36 = vstv %s857_s27  ;;  %s859_s28 = spop %858 }
 0x113   : > { %417 = vst.msk [vmem:[#allocation9] sm:$0x1] %vm387_vm4, %v416_v34  ;;  %v439_v38 = vadd.f32 %v438_v36, %v426_v33  ;;  %v452_v39 = vstv %s859_s28 }
 0x114   : > { %v453_v40 = vadd.f32 %v452_v39, %v441_v35 }
 0x115   : > { %440 = vst.msk [vmem:[#allocation4] sm:$0x1] %vm387_vm4, %v439_v38  ;;  %s861_s29 = spop %860 }
 0x116   : > { %454 = vst.msk [vmem:[#allocation7] sm:$0x1] %vm387_vm4, %v453_v40  ;;  %v467_v43 = vstv %s861_s29  ;;  %s863_s30 = spop %862 }
 0x117   : > { %v468_v44 = vadd.f32 %v467_v43, %v455_v41  ;;  %v490_v45 = vstv %s863_s30  ;;  %s865_s7 = spop %864 }
 0x118   : > { %v491_v47 = vadd.f32 %v490_v45, %v478_v42  ;;  %v504_v48 = vstv %s865_s7  ;;  %s867_s8 = spop %866  ;;  %v659_v21 = vld [vmem:[#allocation3] sm:$0x1] (!%p841_p5) }
 0x119   : > { %469 = vst.msk [vmem:[#allocation10] sm:$0x1] %vm387_vm4, %v468_v44  ;;  %v505_v37 = vadd.f32 %v504_v48, %v493_v17  ;;  %v519_v49 = vstv %s867_s8  ;;  %v656_v9 = vld [vmem:[#allocation6] sm:$0x1] (!%p841_p5)  ;;  %v660_v24 = vmul.f32 (!%p841_p5), 2.0, %v659_v21 }
 0x11a   : > { %492 = vst.msk [vmem:[#allocation5] sm:$0x1] %vm387_vm4, %v491_v47  ;;  %v520_v50 = vadd.f32 %v519_v49, %v507_v46  ;;  %v657_v11 = vld [vmem:[#allocation9] sm:$0x1] (!%p841_p5)  ;;  %vm665_vm5 = vcmp.gt.f32.partialorder (!%p841_p5), %v656_v9, 0.0 }
 0x11b   : > { %506 = vst.msk [vmem:[#allocation8] sm:$0x1] %vm387_vm4, %v505_v37  ;;  %v658_v54 = vadd.f32 (!%p841_p5), %v657_v11, %v656_v9  ;;  %v842_v33 = vsel (!%p841_p5), %vm665_vm5, 1.0, %v966_v32 }
 0x11c   : > { %521 = vst.msk [vmem:[#allocation11] sm:$0x1] %vm387_vm4, %v520_v50  ;;  %v673_v23 = vld [vmem:[#allocation4] sm:$0x1] (!%p841_p5) }
 0x11d   : > { %v670_v12 = vld [vmem:[#allocation7] sm:$0x1] (!%p841_p5)  ;;  %v661_v1 = vmax.f32 (!%p841_p5), %v658_v54, 1e-07  ;;  %v674_v26 = vmul.f32 (!%p841_p5), 2.0, %v673_v23 }
 0x11e   : > { %vm679_vm6 = vcmp.gt.f32.partialorder (!%p841_p5), %v670_v12, 0.0 }
 0x11f   : > { %918 = vrcp.f32 (!%p841_p5), %v661_v1  ;;  %v843_v38 = vsel (!%p841_p5), %vm679_vm6, 1.0, %v966_v32 }
 0x120   : > { %v671_v55 = vld [vmem:[#allocation10] sm:$0x1] (!%p841_p5) }
 0x121   : > { %v672_v10 = vadd.f32 (!%p841_p5), %v671_v55, %v670_v12  ;;  %v687_v25 = vld [vmem:[#allocation5] sm:$0x1] (!%p841_p5) }
 0x122   : > { %v684_v7 = vld [vmem:[#allocation8] sm:$0x1] (!%p841_p5)  ;;  %v688_v29 = vmul.f32 (!%p841_p5), 2.0, %v687_v25 }
 0x123   : > { %v685_v13 = vld [vmem:[#allocation11] sm:$0x1] (!%p841_p5)  ;;  %v675_v14 = vmax.f32 (!%p841_p5), %v672_v10, 1e-07  ;;  %vm693_vm7 = vcmp.gt.f32.partialorder (!%p841_p5), %v684_v7, 0.0 }
 0x124   : > { %v686_v15 = vadd.f32 (!%p841_p5), %v685_v13, %v684_v7  ;;  %v844_v43 = vsel (!%p841_p5), %vm693_vm7, 1.0, %v966_v32 }
 0x125   : > { %920 = vrcp.f32 (!%p841_p5), %v675_v14 }
 0x126   : > { %v689_v18 = vmax.f32 (!%p841_p5), %v686_v15, 1e-07 }
 0x128   : > { %922 = vrcp.f32 (!%p841_p5), %v689_v18 }
 0x129   : > { %s869_s9 = spop %868  ;;  %v919_v27 = vpop.eup (!%p841_p5), %918 }
 0x12a   : > { %v540_v53 = vstv %s869_s9  ;;  %v663_v28 = vmul.f32 (!%p841_p5), %v919_v27, %v660_v24 }
 0x12b   : > { %v541_v56 = vadd.f32 %v540_v53, %v527_v52 }
 0x12c   : > { %v664_v34 = vsub.f32 (!%p841_p5), 1.0, %v663_v28 }
 0x12d   : > { %542 = vst.msk [vmem:[#allocation2] sm:$0x1] %vm387_vm4, %v541_v56 }
 0x12e   : > { %s871_s10 = spop %870  ;;  %v668_v40 = vmul.f32 (!%p841_p5), %v842_v33, %v664_v34 }
 0x12f   : > { %v583_v58 = vstv %s871_s10  ;;  %s873_s11 = spop %872  ;;  %v921_v31 = vpop.eup (!%p841_p5), %920 }
 0x130   : > { %v584_v60 = vadd.f32 %v583_v58, %v568_v51  ;;  %v599_v61 = vstv %s873_s11  ;;  %s875_s12 = spop %874  ;;  %653 = sbr.rel (%p841_p5) target bundleno = 343 (0x157), region = 52  ;;  %v677_v35 = vmul.f32 (!%p841_p5), %v921_v31, %v674_v26 }
 0x131   : > { %v600_v63 = vadd.f32 %v599_v61, %v587_v57  ;;  %v613_v0 = vstv %s875_s12  ;;  %s877_s13 = spop %876 }
 0x132   : > { %585 = vst.msk [vmem:[#allocation12] sm:$0x1] %vm387_vm4, %v584_v60  ;;  %v614_v3 = vadd.f32 %v613_v0, %v602_v59  ;;  %v628_v4 = vstv %s877_s13  ;;  %s879_s14 = spop %878  ;;  %v923_v36 = vpop.eup (!%p841_p5), %922  ;;  %v678_v41 = vsub.f32 (!%p841_p5), 1.0, %v677_v35 }
 0x133   : > { %601 = vst.msk [vmem:[#allocation13] sm:$0x1] %vm387_vm4, %v600_v63  ;;  %v629_v5 = vadd.f32 %v628_v4, %v616_v62  ;;  %v647_v6 = vstv %s879_s14  ;;  %v691_v42 = vmul.f32 (!%p841_p5), %v923_v36, %v688_v29 }
 0x134   : > { %615 = vst.msk [vmem:[#allocation14] sm:$0x1] %vm387_vm4, %v614_v3  ;;  %v648_v8 = vadd.f32 %v647_v6, %v634_v2  ;;  %v682_v44 = vmul.f32 (!%p841_p5), %v843_v38, %v678_v41  ;;  %v654_v46 = vld [vmem:[#allocation2] sm:$0x1] (!%p841_p5) }
 0x135   : > { %630 = vst.msk [vmem:[#allocation15] sm:$0x1] %vm387_vm4, %v629_v5  ;;  %v692_v45 = vsub.f32 (!%p841_p5), 1.0, %v691_v42  ;;  %v655_v50 = vmul.f32 (!%p841_p5), 0.0024038462, %v654_v46 }
 0x136   : > { %649 = vst.msk [vmem:[#allocation16] sm:$0x1] %vm387_vm4, %v648_v8  ;;  %v683_v48 = vadd.f32 (!%p841_p5), %v682_v44, %v668_v40 }
 0x137   : > { %v696_v37 = vmul.f32 %v844_v43, %v692_v45 }
 0x139   : > { %v699_v49 = vld [vmem:[#allocation12] sm:$0x1]  ;;  %v697_v52 = vadd.f32 %v696_v37, %v683_v48 }
 0x13a   : > { %v704_v30 = vld [vmem:[#allocation13] sm:$0x1]  ;;  %v700_v57 = vmul.f32 0.0024038462, %v699_v49 }
 0x13b   : > { %v701_v16 = vld [vmem:[#allocation14] sm:$0x1]  ;;  %v705_v39 = vmul.f32 2.0, %v704_v30  ;;  %v698_v51 = vmul.f32 0.33333334, %v697_v52 }
 0x13c   : > { %v702_v19 = vld [vmem:[#allocation15] sm:$0x1]  ;;  %vm710_vm8 = vcmp.gt.f32.partialorder %v701_v16, 0.0 }
 0x13d   : > { %v703_v20 = vadd.f32 %v702_v19, %v701_v16  ;;  %v845_v56 = vsel %vm710_vm8, 1.0, %v966_v32  ;;  %v715_v58 = vld [vmem:[#allocation16] sm:$0x1]  ;;  %v717_v60 = vadd.f32 %v698_v51, %v655_v50 }
 0x13e   : > { %v716_v61 = vmul.f32 0.0012019231, %v715_v58 }
 0x13f   : > { %v706_v22 = vmax.f32 %v703_v20, 1e-07  ;;  %v718_v62 = vadd.f32 %v717_v60, %v700_v57 }
 0x141   : > { %924 = vrcp.f32 %v706_v22 }
 0x14b   : > { %v925_v17 = vpop.eup %924 }
 0x14c   : > { %v708_v47 = vmul.f32 %v925_v17, %v705_v39 }
 0x14e   : > { %v709_v53 = vsub.f32 1.0, %v708_v47 }
 0x150   : > { %v713_v59 = vmul.f32 %v845_v56, %v709_v53 }
 0x152   : > { %v719_v63 = vadd.f32 %v718_v62, %v713_v59 }
 0x154   : > { %v720_v0 = vadd.f32 %v719_v63, %v716_v61 }
 0x156   : > { %721 = vst.msk [vmem:[#allocation17] sm:$0x1] %vm387_vm4, %v720_v0 }
 0x157 PF: > { %p884_p6 = scmp.eq.s32.totalorder %s1009_s22, 1  ;;  %s967_s15 = smov [#allocation17]  }
 0x158   : > { %s729_s16 = sshll.u32 %s967_s15, 4  ;;  %s730_s16 = int_to_ptr.vmem [resolvable:$true] %s729_s16 }
 0x159   : > { %s926_s17 = scalar_lea.vmem %s730_s16, 16  ;;  %s932_s18 = scalar_lea.vmem %s730_s16, 32 }
 0x15a   : > { %p927_p7 = scmp.ne.s32.totalorder %s730_s16, %s926_s17  ;;  %p933_p10 = scmp.lt.s32.totalorder %s730_s16, %s730_s16 }
 0x15b   : > { %p934_p11 = scmp.lt.s32.totalorder %s932_s18, %s926_s17 }
 0x15c   : > { %p928_p8 = pnand %p927_p7, %p884_p6 }
 0x15d   : > { %p935_p12 = por %p934_p11, %p933_p10 }
 0x15e   : > { %p929_p9 = pneg %p928_p8 }
 0x160   : > { %p936_p13 = pnand %p935_p12, %p929_p9 }
 0x162   : > { %939 = shalt.err (!%p936_p13)
}
 0x163   : > { %s940_s23 = scalar_lea.hbm %s1189_s6, 16 }
 0x164   : > { %p941_p0 = scmp.ne.s32.totalorder %s1189_s6, %s940_s23  ;;  %p946_p3 = scmp.lt.u32.totalorder %s940_s23, %s1189_s6 }
 0x166   : > { %p942_p1 = pnand %p941_p0, %p884_p6 }
 0x168   : > { %p943_p2 = pneg %p942_p1 }
 0x16a   : > { %p948_p4 = pnand %p946_p3, %p943_p2 }
 0x16c   : > { %951 = shalt.err (!%p948_p4)
}
 0x16d   : > { %881 = dma.vmem_to_hbm [thread:$0]  (%p884_p6), %s730_s16, 16, %s1189_s6, [#allocation18]  }
 0x16e   : > { %957 = dma.done.wait (%p884_p6), [#allocation18], 16  }
 0x16f   : > { %959 = vsyncadd (%p884_p6), [#allocation18], 4294967280 }
 0x170 PF: > { %s17_s21 = sadd.s32 1, %s962_s21  }
 0x171   : > { %p14_p5 = scmp.ge.s32.totalorder %s17_s21, 4  }
 0x173   :  { %16 = sbr.rel (!%p14_p5) target bundleno = 1 (0x1), region = 94 }
 0x17a   :  { %742 = vsyncpa [#allocation18], 1 }
 0x17b   :  { %744 = vsyncpa [#allocation18 + $0x1], 1 }

</bundles_post_ra>
